<compile_context>
chip_gen: v7x
topology: tpu7x:2x2x1
jax: 0.10.0
libtpu: 0.0.40
codegen_flags: <defaults>
</compile_context>

<pallas_src>
import numpy as np
import jax
import jax.numpy as jnp
from jax.experimental import pallas as pl
from jax.experimental.pallas import tpu as pltpu

# ----------------------------- model config (small, synthetic) -----------------------------
VOCAB_SIZE = 32
EMBEDDING_DIM = 32
HIDDEN_DIM = 32
NUM_LAYERS = 2          # kernel below is specialized to 2 layers (matches the module)
BATCH = 2
SEQ = 8
LANE = 128


# ----------------------------- Pallas kernel -----------------------------
def stacked_lstm_kernel(x_ref, h0_ref, c0_ref,
                        wih0_ref, b0_ref,
                        wrec_ref, b1_ref,
                        wfc_ref, bfc_ref,
                        out_ref, hn_ref, cn_ref,
                        xg_scratch, h1_scratch, hh_buf):
    TB, _ = x_ref.shape
    L, B, H = hn_ref.shape
    T = TB // B
    G = 4 * H

    # ---- prologue: hoisted layer-0 input projection for all T*B rows (one bf16 matmul) ----
    xg = jnp.dot(x_ref[...], wih0_ref[...],
                 preferred_element_type=jnp.float32) + b0_ref[...]     # (T*B, 4H) f32
    xg_scratch[...] = xg

    # loop-invariant loads / broadcasts, hoisted out of the recurrence
    wrec = wrec_ref[...]                                               # (2H, 8H) bf16
    b1 = jnp.broadcast_to(b1_ref[...], (B, G))                         # (B, 4H) f32

    def gate_act(g):
        # gate columns were permuted to [i, f, o, g] in the wrapper:
        # 1 sigmoid over 3H lanes + 1 tanh over H lanes (instead of 2 passes over 4H).
        sig = jax.nn.sigmoid(g[:, :3 * H])
        th = jnp.tanh(g[:, 3 * H:])
        return sig[:, :H], sig[:, H:2 * H], sig[:, 2 * H:3 * H], th    # i, f, o, g

    # seed the persistent recurrent-LHS buffer: [h0_prev | h1_prev] in bf16
    h0 = h0_ref[0]
    c0 = c0_ref[0]
    h1 = h0_ref[1]
    c1 = c0_ref[1]
    hh_buf[:, :H] = h0.astype(jnp.bfloat16)
    hh_buf[:, H:] = h1.astype(jnp.bfloat16)

    # ---- staggered recurrence: iteration s computes layer-0 step s and layer-1 step s-1
    # with ONE (B,2H)x(2H,8H) bf16 matmul.  T is small & static here, so a Python loop is a
    # full unroll; at production T move this onto a grid axis / fori_loop with unroll=4-8.
    for s in range(T + 1):
        gates = jnp.dot(hh_buf[...], wrec,
                        preferred_element_type=jnp.float32)            # (B, 8H) f32

        if s < T:                                                      # layer-0, step s
            g0 = xg_scratch[pl.ds(s * B, B)] + gates[:, :G]
            i0, f0, o0, gg0 = gate_act(g0)
            c0 = f0 * c0 + i0 * gg0
            h0 = o0 * jnp.tanh(c0)
            hh_buf[:, :H] = h0.astype(jnp.bfloat16)                    # LHS for iteration s+1

        if s >= 1:                                                     # layer-1, step s-1
            g1 = gates[:, G:] + b1
            i1, f1, o1, gg1 = gate_act(g1)
            c1 = f1 * c1 + i1 * gg1
            h1 = o1 * jnp.tanh(c1)
            h1_scratch[pl.ds((s - 1) * B, B)] = h1.astype(jnp.bfloat16)
            if s < T:
                hh_buf[:, H:] = h1.astype(jnp.bfloat16)                # LHS for iteration s+1

    # final (h_n, c_n): written once, after the loop (f32, from the f32 cell math)
    hn_ref[0] = h0
    hn_ref[1] = h1
    cn_ref[0] = c0
    cn_ref[1] = c1

    # ---- epilogue: one batched, lane-dense fc matmul over all T*B rows ----
    logits = jnp.dot(h1_scratch[...], wfc_ref[...],
                     preferred_element_type=jnp.float32) + bfc_ref[...]   # (T*B, VPAD) f32
    out_ref[...] = logits.astype(out_ref.dtype)


# ----------------------------- wrapper -----------------------------
def stacked_lstm_forward(tokens, hidden, params):
    """tokens: (B, T) int32; hidden: tuple of (L, B, H) arrays."""
    emb = params["embedding"][tokens]                              # (B, T, E) -- gather in JAX glue
    h0, c0 = hidden
    B, T, E = emb.shape
    L, _, H = h0.shape
    assert L == 2, "kernel is specialized to num_layers=2"
    G = 4 * H
    V = params["w_fc"].shape[0]
    VPAD = ((V + LANE - 1) // LANE) * LANE                         # lane-dense fc output

    # flattened time-major bf16 input slab (T*B, E)
    x_flat = jnp.transpose(emb, (1, 0, 2)).reshape(T * B, E).astype(jnp.bfloat16)

    # gate-column permutation: PyTorch [i, f, g, o] -> [i, f, o, g]
    perm = jnp.concatenate([jnp.arange(2 * H), jnp.arange(3 * H, 4 * H),
                            jnp.arange(2 * H, 3 * H)])

    def gperm(w_t):                                                # (in, 4H) -> permuted cols
        return w_t[:, perm]

    wih0_t = gperm(params["w_ih_l0"].T).astype(jnp.bfloat16)       # (E, 4H)
    b0 = (params["b_ih_l0"] + params["b_hh_l0"])[perm].reshape(1, G).astype(jnp.float32)

    # fused / staggered recurrent weight: [h0_prev | h1_prev] (B,2H)  @  (2H, 8H)
    #   rows 0:H   -> [ W_hh0^T | W_ih1^T ]
    #   rows H:2H  -> [    0    | W_hh1^T ]
    whh0_t = gperm(params["w_hh_l0"].T)
    wih1_t = gperm(params["w_ih_l1"].T)
    whh1_t = gperm(params["w_hh_l1"].T)
    wrec = (jnp.zeros((2 * H, 2 * G), jnp.float32)
            .at[:H, :G].set(whh0_t)
            .at[:H, G:].set(wih1_t)
            .at[H:, G:].set(whh1_t)).astype(jnp.bfloat16)
    b1 = (params["b_ih_l1"] + params["b_hh_l1"])[perm].reshape(1, G).astype(jnp.float32)

    wfc_t = (jnp.zeros((H, VPAD), jnp.float32)
             .at[:, :V].set(params["w_fc"].T)).astype(jnp.bfloat16)
    bfc = jnp.zeros((1, VPAD), jnp.float32).at[:, :V].set(params["b_fc"])

    grid_spec = pltpu.PrefetchScalarGridSpec(
        num_scalar_prefetch=0,
        grid=(1,),                                                 # whole toy problem fits VMEM
        in_specs=[
            pl.BlockSpec((T * B, E), lambda i: (0, 0)),            # x (flattened time-major)
            pl.BlockSpec((L, B, H), lambda i: (0, 0, 0)),          # h0
            pl.BlockSpec((L, B, H), lambda i: (0, 0, 0)),          # c0
            pl.BlockSpec((E, G), lambda i: (0, 0)),                # W_ih layer0 (T, bf16)
            pl.BlockSpec((1, G), lambda i: (0, 0)),                # bias layer0
            pl.BlockSpec((2 * H, 2 * G), lambda i: (0, 0)),        # fused recurrent W (bf16)
            pl.BlockSpec((1, G), lambda i: (0, 0)),                # bias layer1
            pl.BlockSpec((H, VPAD), lambda i: (0, 0)),             # W_fc (T, lane-padded, bf16)
            pl.BlockSpec((1, VPAD), lambda i: (0, 0)),             # b_fc (lane-padded)
        ],
        out_specs=[
            pl.BlockSpec((T * B, VPAD), lambda i: (0, 0)),         # logits slab (lane-dense)
            pl.BlockSpec((L, B, H), lambda i: (0, 0, 0)),          # h_n
            pl.BlockSpec((L, B, H), lambda i: (0, 0, 0)),          # c_n
        ],
        scratch_shapes=[
            pltpu.VMEM((T * B, G), jnp.float32),                   # precomputed x-gate contrib
            pltpu.VMEM((T * B, H), jnp.bfloat16),                  # per-step h1 for fc epilogue
            pltpu.VMEM((B, 2 * H), jnp.bfloat16),                  # persistent recurrent LHS
        ],
    )

    flops = (2 * T * B * E * G                     # prologue xg
             + 2 * (T + 1) * B * (2 * H) * (2 * G)  # fused recurrence
             + 2 * T * B * H * VPAD)               # fc epilogue
    cost = pl.CostEstimate(
        flops=int(flops),
        transcendentals=int(2 * T * B * 5 * H),
        bytes_accessed=int(x_flat.size * 2 + wih0_t.size * 2 + wrec.size * 2
                           + wfc_t.size * 2 + T * B * VPAD * 4 + 4 * L * B * H * 4),
    )

    out_flat, hn, cn = pl.pallas_call(
        stacked_lstm_kernel,
        out_shape=(jax.ShapeDtypeStruct((T * B, VPAD), jnp.float32),
                   jax.ShapeDtypeStruct((L, B, H), jnp.float32),
                   jax.ShapeDtypeStruct((L, B, H), jnp.float32)),
        grid_spec=grid_spec,
        compiler_params=pltpu.CompilerParams(
            dimension_semantics=("arbitrary",),                    # recurrence: never "parallel"
            vmem_limit_bytes=32 * 1024 * 1024),
        cost_estimate=cost,
    )(x_flat, h0.astype(jnp.float32), c0.astype(jnp.float32),
      wih0_t, b0, wrec, b1, wfc_t, bfc)

    out = jnp.transpose(out_flat.reshape(T, B, VPAD)[:, :, :V], (1, 0, 2))  # (B, T, V)
    return out, (hn, cn)


# ----------------------------- pure-JAX reference (f32) -----------------------------
def stacked_lstm_reference(tokens, hidden, params):
    emb = params["embedding"][tokens]                              # (B, T, E)
    h0, c0 = hidden

    def cell(x_t, h_prev, c_prev, wih, whh, bih, bhh):
        gates = x_t @ wih.T + bih + h_prev @ whh.T + bhh
        i, f, g, o = jnp.split(gates, 4, axis=-1)
        i, f, o = jax.nn.sigmoid(i), jax.nn.sigmoid(f), jax.nn.sigmoid(o)
        g = jnp.tanh(g)
        c = f * c_prev + i * g
        h = o * jnp.tanh(c)
        return h, c

    def step(carry, x_t):
        h0_, c0_, h1_, c1_ = carry
        h0n, c0n = cell(x_t, h0_, c0_, params["w_ih_l0"], params["w_hh_l0"],
                        params["b_ih_l0"], params["b_hh_l0"])
        h1n, c1n = cell(h0n, h1_, c1_, params["w_ih_l1"], params["w_hh_l1"],
                        params["b_ih_l1"], params["b_hh_l1"])
        return (h0n, c0n, h1n, c1n), h1n

    carry0 = (h0[0], c0[0], h0[1], c0[1])
    carry, outs_tm = jax.lax.scan(step, carry0, jnp.transpose(emb, (1, 0, 2)))
    outs = jnp.transpose(outs_tm, (1, 0, 2))                       # (B, T, H)
    logits = outs @ params["w_fc"].T + params["b_fc"]
    hn = jnp.stack([carry[0], carry[2]])
    cn = jnp.stack([carry[1], carry[3]])
    return logits, (hn, cn)


# ----------------------------- params / main -----------------------------
def init_params(key):
    k = 1.0 / np.sqrt(HIDDEN_DIM)
    keys = jax.random.split(key, 12)
    u = lambda kk, shape, lim: jax.random.uniform(kk, shape, jnp.float32, -lim, lim)
    return {
        "embedding": jax.random.normal(keys[0], (VOCAB_SIZE, EMBEDDING_DIM), jnp.float32),
        "w_ih_l0": u(keys[1], (4 * HIDDEN_DIM, EMBEDDING_DIM), k),
        "w_hh_l0": u(keys[2], (4 * HIDDEN_DIM, HIDDEN_DIM), k),
        "b_ih_l0": u(keys[3], (4 * HIDDEN_DIM,), k),
        "b_hh_l0": u(keys[4], (4 * HIDDEN_DIM,), k),
        "w_ih_l1": u(keys[5], (4 * HIDDEN_DIM, HIDDEN_DIM), k),
        "w_hh_l1": u(keys[6], (4 * HIDDEN_DIM, HIDDEN_DIM), k),
        "b_ih_l1": u(keys[7], (4 * HIDDEN_DIM,), k),
        "b_hh_l1": u(keys[8], (4 * HIDDEN_DIM,), k),
        "w_fc": u(keys[9], (VOCAB_SIZE, HIDDEN_DIM), k),
        "b_fc": u(keys[10], (VOCAB_SIZE,), k),
    }


if __name__ == "__main__":
    key = jax.random.PRNGKey(0)
    pkey, tkey = jax.random.split(key)
    params = init_params(pkey)

    tokens = jax.random.randint(tkey, (BATCH, SEQ), 0, VOCAB_SIZE, dtype=jnp.int32)
    # init_hidden equivalent
    hidden = (jnp.zeros((NUM_LAYERS, BATCH, HIDDEN_DIM), jnp.float32),
              jnp.zeros((NUM_LAYERS, BATCH, HIDDEN_DIM), jnp.float32))

    out, (hn, cn) = stacked_lstm_forward(tokens, hidden, params)
    out = jax.block_until_ready(out)
    hn = jax.block_until_ready(hn)
    cn = jax.block_until_ready(cn)

    ref_out, (ref_hn, ref_cn) = stacked_lstm_reference(tokens, hidden, params)
    # Tolerance loosened vs. the f32 version because MXU operands are bf16 (f32 accumulate).
    np.testing.assert_allclose(np.asarray(out), np.asarray(ref_out), rtol=5e-2, atol=5e-2)
    np.testing.assert_allclose(np.asarray(hn), np.asarray(ref_hn), rtol=5e-2, atol=5e-2)
    np.testing.assert_allclose(np.asarray(cn), np.asarray(ref_cn), rtol=5e-2, atol=5e-2)

    print("KERNEL_OK")
</pallas_src>

<mosaic_0001>
module attributes {stable_mosaic.version = 11 : i64} {
  func.func @stacked_lstm_kernel(%arg0: i32, %arg1: memref<16x32xbf16, #tpu.memory_space<vmem>>, %arg2: memref<2x2x32xf32, #tpu.memory_space<vmem>>, %arg3: memref<2x2x32xf32, #tpu.memory_space<vmem>>, %arg4: memref<32x128xbf16, #tpu.memory_space<vmem>>, %arg5: memref<1x128xf32, #tpu.memory_space<vmem>>, %arg6: memref<64x256xbf16, #tpu.memory_space<vmem>>, %arg7: memref<1x128xf32, #tpu.memory_space<vmem>>, %arg8: memref<32x128xbf16, #tpu.memory_space<vmem>>, %arg9: memref<1x128xf32, #tpu.memory_space<vmem>>, %arg10: memref<16x128xf32, #tpu.memory_space<vmem>>, %arg11: memref<2x2x32xf32, #tpu.memory_space<vmem>>, %arg12: memref<2x2x32xf32, #tpu.memory_space<vmem>>, %arg13: memref<16x128xf32, #tpu.memory_space<vmem>>, %arg14: memref<16x32xbf16, #tpu.memory_space<vmem>>, %arg15: memref<2x64xbf16, #tpu.memory_space<vmem>>) attributes {dimension_semantics = [#tpu.dimension_semantics<arbitrary>], iteration_bounds = array<i64: 1>, scalar_prefetch = 0 : i64, scratch_operands = 3 : i64, tpu.core_type = #tpu.core_type<tc>, window_params = [{pipeline_mode = #tpu.pipeline_mode<synchronous>, transform_indices = @transform_0, window_bounds = array<i64: 16, 32>}, {pipeline_mode = #tpu.pipeline_mode<synchronous>, transform_indices = @transform_1, window_bounds = array<i64: 2, 2, 32>}, {pipeline_mode = #tpu.pipeline_mode<synchronous>, transform_indices = @transform_2, window_bounds = array<i64: 2, 2, 32>}, {pipeline_mode = #tpu.pipeline_mode<synchronous>, transform_indices = @transform_3, window_bounds = array<i64: 32, 128>}, {pipeline_mode = #tpu.pipeline_mode<synchronous>, transform_indices = @transform_4, window_bounds = array<i64: 1, 128>}, {pipeline_mode = #tpu.pipeline_mode<synchronous>, transform_indices = @transform_5, window_bounds = array<i64: 64, 256>}, {pipeline_mode = #tpu.pipeline_mode<synchronous>, transform_indices = @transform_6, window_bounds = array<i64: 1, 128>}, {pipeline_mode = #tpu.pipeline_mode<synchronous>, transform_indices = @transform_7, window_bounds = array<i64: 32, 128>}, {pipeline_mode = #tpu.pipeline_mode<synchronous>, transform_indices = @transform_8, window_bounds = array<i64: 1, 128>}, {pipeline_mode = #tpu.pipeline_mode<synchronous>, transform_indices = @transform_9, window_bounds = array<i64: 16, 128>}, {pipeline_mode = #tpu.pipeline_mode<synchronous>, transform_indices = @transform_10, window_bounds = array<i64: 2, 2, 32>}, {pipeline_mode = #tpu.pipeline_mode<synchronous>, transform_indices = @transform_11, window_bounds = array<i64: 2, 2, 32>}]} {
    %c0 = arith.constant 0 : index
    %c0_0 = arith.constant 0 : index
    %0 = vector.load %arg1[%c0, %c0_0] : memref<16x32xbf16, #tpu.memory_space<vmem>>, vector<16x32xbf16>
    %c0_1 = arith.constant 0 : index
    %c0_2 = arith.constant 0 : index
    %1 = vector.load %arg4[%c0_1, %c0_2] : memref<32x128xbf16, #tpu.memory_space<vmem>>, vector<32x128xbf16>
    %cst = arith.constant dense<0.000000e+00> : vector<16x128xf32>
    %2 = tpu.matmul %0, %1, %cst {dimension_numbers = #tpu.dot_dimension_numbers<[1], [0], [0], [1], [0, 0, 1, 1], [], []>} : vector<16x32xbf16>, vector<32x128xbf16>, vector<16x128xf32> -> vector<16x128xf32>
    %c0_3 = arith.constant 0 : index
    %c0_4 = arith.constant 0 : index
    %3 = vector.load %arg5[%c0_3, %c0_4] : memref<1x128xf32, #tpu.memory_space<vmem>>, vector<1x128xf32>
    %4 = vector.broadcast %3 : vector<1x128xf32> to vector<16x128xf32>
    %5 = arith.addf %2, %4 : vector<16x128xf32>
    %c0_5 = arith.constant 0 : index
    %c0_6 = arith.constant 0 : index
    %6 = vector.load %arg13[%c0_5, %c0_6] : memref<16x128xf32, #tpu.memory_space<vmem>>, vector<16x128xf32>
    tpu.vector_store %arg13[%c0_5, %c0_6], %5 {strides = array<i32>} : memref<16x128xf32, #tpu.memory_space<vmem>>, vector<16x128xf32>,
    %c0_7 = arith.constant 0 : index
    %c0_8 = arith.constant 0 : index
    %7 = vector.load %arg6[%c0_7, %c0_8] : memref<64x256xbf16, #tpu.memory_space<vmem>>, vector<64x256xbf16>
    %c0_9 = arith.constant 0 : index
    %c0_10 = arith.constant 0 : index
    %8 = vector.load %arg7[%c0_9, %c0_10] : memref<1x128xf32, #tpu.memory_space<vmem>>, vector<1x128xf32>
    %9 = vector.shape_cast %8 : vector<1x128xf32> to vector<1x128xf32>
    %10 = vector.broadcast %9 : vector<1x128xf32> to vector<2x128xf32>
    %c0_11 = arith.constant 0 : index
    %c0_12 = arith.constant 0 : index
    %c0_13 = arith.constant 0 : index
    %11 = vector.load %arg2[%c0_11, %c0_12, %c0_13] : memref<2x2x32xf32, #tpu.memory_space<vmem>>, vector<1x2x32xf32>
    %12 = vector.shape_cast %11 : vector<1x2x32xf32> to vector<2x32xf32>
    %c0_14 = arith.constant 0 : index
    %c0_15 = arith.constant 0 : index
    %c0_16 = arith.constant 0 : index
    %13 = vector.load %arg3[%c0_14, %c0_15, %c0_16] : memref<2x2x32xf32, #tpu.memory_space<vmem>>, vector<1x2x32xf32>
    %14 = vector.shape_cast %13 : vector<1x2x32xf32> to vector<2x32xf32>
    %c1 = arith.constant 1 : index
    %c0_17 = arith.constant 0 : index
    %c0_18 = arith.constant 0 : index
    %15 = vector.load %arg2[%c1, %c0_17, %c0_18] : memref<2x2x32xf32, #tpu.memory_space<vmem>>, vector<1x2x32xf32>
    %16 = vector.shape_cast %15 : vector<1x2x32xf32> to vector<2x32xf32>
    %c1_19 = arith.constant 1 : index
    %c0_20 = arith.constant 0 : index
    %c0_21 = arith.constant 0 : index
    %17 = vector.load %arg3[%c1_19, %c0_20, %c0_21] : memref<2x2x32xf32, #tpu.memory_space<vmem>>, vector<1x2x32xf32>
    %18 = vector.shape_cast %17 : vector<1x2x32xf32> to vector<2x32xf32>
    %19 = arith.truncf %12 : vector<2x32xf32> to vector<2x32xbf16>
    %c0_22 = arith.constant 0 : index
    %c0_23 = arith.constant 0 : index
    %20 = vector.load %arg15[%c0_22, %c0_23] : memref<2x64xbf16, #tpu.memory_space<vmem>>, vector<2x32xbf16>
    tpu.vector_store %arg15[%c0_22, %c0_23], %19 {strides = array<i32>} : memref<2x64xbf16, #tpu.memory_space<vmem>>, vector<2x32xbf16>,
    %21 = arith.truncf %16 : vector<2x32xf32> to vector<2x32xbf16>
    %c0_24 = arith.constant 0 : index
    %c32 = arith.constant 32 : index
    %22 = vector.load %arg15[%c0_24, %c32] : memref<2x64xbf16, #tpu.memory_space<vmem>>, vector<2x32xbf16>
    tpu.vector_store %arg15[%c0_24, %c32], %21 {strides = array<i32>} : memref<2x64xbf16, #tpu.memory_space<vmem>>, vector<2x32xbf16>,
    %c0_25 = arith.constant 0 : index
    %c0_26 = arith.constant 0 : index
    %23 = vector.load %arg15[%c0_25, %c0_26] : memref<2x64xbf16, #tpu.memory_space<vmem>>, vector<2x64xbf16>
    %cst_27 = arith.constant dense<0.000000e+00> : vector<2x256xf32>
    %24 = tpu.matmul %23, %7, %cst_27 {dimension_numbers = #tpu.dot_dimension_numbers<[1], [0], [0], [1], [0, 0, 1, 1], [], []>} : vector<2x64xbf16>, vector<64x256xbf16>, vector<2x256xf32> -> vector<2x256xf32>
    %c0_28 = arith.constant 0 : index
    %c0_29 = arith.constant 0 : index
    %25 = vector.load %arg13[%c0_28, %c0_29] : memref<16x128xf32, #tpu.memory_space<vmem>>, vector<2x128xf32>
    %26 = vector.extract_strided_slice %24 {offsets = [0, 0], sizes = [2, 128], strides = [1, 1]} : vector<2x256xf32> to vector<2x128xf32>
    %27 = arith.addf %25, %26 : vector<2x128xf32>
    %28 = vector.extract_strided_slice %27 {offsets = [0, 0], sizes = [2, 96], strides = [1, 1]} : vector<2x128xf32> to vector<2x96xf32>
    %29 = arith.negf %28 : vector<2x96xf32>
    %30 = math.exp %29 : vector<2x96xf32>
    %cst_30 = arith.constant 1.000000e+00 : f32
    %31 = vector.broadcast %cst_30 : f32 to vector<2x96xf32>
    %32 = arith.addf %31, %30 : vector<2x96xf32>
    %33 = arith.divf %31, %32 : vector<2x96xf32>
    %34 = vector.extract_strided_slice %27 {offsets = [0, 96], sizes = [2, 32], strides = [1, 1]} : vector<2x128xf32> to vector<2x32xf32>
    %35 = math.tanh %34 : vector<2x32xf32>
    %36 = vector.extract_strided_slice %33 {offsets = [0, 0], sizes = [2, 32], strides = [1, 1]} : vector<2x96xf32> to vector<2x32xf32>
    %37 = vector.extract_strided_slice %33 {offsets = [0, 32], sizes = [2, 32], strides = [1, 1]} : vector<2x96xf32> to vector<2x32xf32>
    %38 = vector.extract_strided_slice %33 {offsets = [0, 64], sizes = [2, 32], strides = [1, 1]} : vector<2x96xf32> to vector<2x32xf32>
    %39 = arith.mulf %37, %14 : vector<2x32xf32>
    %40 = arith.mulf %36, %35 : vector<2x32xf32>
    %41 = arith.addf %39, %40 : vector<2x32xf32>
    %42 = math.tanh %41 : vector<2x32xf32>
    %43 = arith.mulf %38, %42 : vector<2x32xf32>
    %44 = arith.truncf %43 : vector<2x32xf32> to vector<2x32xbf16>
    %c0_31 = arith.constant 0 : index
    %c0_32 = arith.constant 0 : index
    %45 = vector.load %arg15[%c0_31, %c0_32] : memref<2x64xbf16, #tpu.memory_space<vmem>>, vector<2x32xbf16>
    tpu.vector_store %arg15[%c0_31, %c0_32], %44 {strides = array<i32>} : memref<2x64xbf16, #tpu.memory_space<vmem>>, vector<2x32xbf16>,
    %c0_33 = arith.constant 0 : index
    %c0_34 = arith.constant 0 : index
    %46 = vector.load %arg15[%c0_33, %c0_34] : memref<2x64xbf16, #tpu.memory_space<vmem>>, vector<2x64xbf16>
    %cst_35 = arith.constant dense<0.000000e+00> : vector<2x256xf32>
    %47 = tpu.matmul %46, %7, %cst_35 {dimension_numbers = #tpu.dot_dimension_numbers<[1], [0], [0], [1], [0, 0, 1, 1], [], []>} : vector<2x64xbf16>, vector<64x256xbf16>, vector<2x256xf32> -> vector<2x256xf32>
    %c2 = arith.constant 2 : index
    %c0_36 = arith.constant 0 : index
    %48 = vector.load %arg13[%c2, %c0_36] : memref<16x128xf32, #tpu.memory_space<vmem>>, vector<2x128xf32>
    %49 = vector.extract_strided_slice %47 {offsets = [0, 0], sizes = [2, 128], strides = [1, 1]} : vector<2x256xf32> to vector<2x128xf32>
    %50 = arith.addf %48, %49 : vector<2x128xf32>
    %51 = vector.extract_strided_slice %50 {offsets = [0, 0], sizes = [2, 96], strides = [1, 1]} : vector<2x128xf32> to vector<2x96xf32>
    %52 = arith.negf %51 : vector<2x96xf32>
    %53 = math.exp %52 : vector<2x96xf32>
    %cst_37 = arith.constant 1.000000e+00 : f32
    %54 = vector.broadcast %cst_37 : f32 to vector<2x96xf32>
    %55 = arith.addf %54, %53 : vector<2x96xf32>
    %56 = arith.divf %54, %55 : vector<2x96xf32>
    %57 = vector.extract_strided_slice %50 {offsets = [0, 96], sizes = [2, 32], strides = [1, 1]} : vector<2x128xf32> to vector<2x32xf32>
    %58 = math.tanh %57 : vector<2x32xf32>
    %59 = vector.extract_strided_slice %56 {offsets = [0, 0], sizes = [2, 32], strides = [1, 1]} : vector<2x96xf32> to vector<2x32xf32>
    %60 = vector.extract_strided_slice %56 {offsets = [0, 32], sizes = [2, 32], strides = [1, 1]} : vector<2x96xf32> to vector<2x32xf32>
    %61 = vector.extract_strided_slice %56 {offsets = [0, 64], sizes = [2, 32], strides = [1, 1]} : vector<2x96xf32> to vector<2x32xf32>
    %62 = arith.mulf %60, %41 : vector<2x32xf32>
    %63 = arith.mulf %59, %58 : vector<2x32xf32>
    %64 = arith.addf %62, %63 : vector<2x32xf32>
    %65 = math.tanh %64 : vector<2x32xf32>
    %66 = arith.mulf %61, %65 : vector<2x32xf32>
    %67 = arith.truncf %66 : vector<2x32xf32> to vector<2x32xbf16>
    %c0_38 = arith.constant 0 : index
    %c0_39 = arith.constant 0 : index
    %68 = vector.load %arg15[%c0_38, %c0_39] : memref<2x64xbf16, #tpu.memory_space<vmem>>, vector<2x32xbf16>
    tpu.vector_store %arg15[%c0_38, %c0_39], %67 {strides = array<i32>} : memref<2x64xbf16, #tpu.memory_space<vmem>>, vector<2x32xbf16>,
    %69 = vector.extract_strided_slice %47 {offsets = [0, 128], sizes = [2, 128], strides = [1, 1]} : vector<2x256xf32> to vector<2x128xf32>
    %70 = arith.addf %69, %10 : vector<2x128xf32>
    %71 = vector.extract_strided_slice %70 {offsets = [0, 0], sizes = [2, 96], strides = [1, 1]} : vector<2x128xf32> to vector<2x96xf32>
    %72 = arith.negf %71 : vector<2x96xf32>
    %73 = math.exp %72 : vector<2x96xf32>
    %cst_40 = arith.constant 1.000000e+00 : f32
    %74 = vector.broadcast %cst_40 : f32 to vector<2x96xf32>
    %75 = arith.addf %74, %73 : vector<2x96xf32>
    %76 = arith.divf %74, %75 : vector<2x96xf32>
    %77 = vector.extract_strided_slice %70 {offsets = [0, 96], sizes = [2, 32], strides = [1, 1]} : vector<2x128xf32> to vector<2x32xf32>
    %78 = math.tanh %77 : vector<2x32xf32>
    %79 = vector.extract_strided_slice %76 {offsets = [0, 0], sizes = [2, 32], strides = [1, 1]} : vector<2x96xf32> to vector<2x32xf32>
    %80 = vector.extract_strided_slice %76 {offsets = [0, 32], sizes = [2, 32], strides = [1, 1]} : vector<2x96xf32> to vector<2x32xf32>
    %81 = vector.extract_strided_slice %76 {offsets = [0, 64], sizes = [2, 32], strides = [1, 1]} : vector<2x96xf32> to vector<2x32xf32>
    %82 = arith.mulf %80, %18 : vector<2x32xf32>
    %83 = arith.mulf %79, %78 : vector<2x32xf32>
    %84 = arith.addf %82, %83 : vector<2x32xf32>
    %85 = math.tanh %84 : vector<2x32xf32>
    %86 = arith.mulf %81, %85 : vector<2x32xf32>
    %87 = arith.truncf %86 : vector<2x32xf32> to vector<2x32xbf16>
    %c0_41 = arith.constant 0 : index
    %c0_42 = arith.constant 0 : index
    %88 = vector.load %arg14[%c0_41, %c0_42] : memref<16x32xbf16, #tpu.memory_space<vmem>>, vector<2x32xbf16>
    tpu.vector_store %arg14[%c0_41, %c0_42], %87 {strides = array<i32>} : memref<16x32xbf16, #tpu.memory_space<vmem>>, vector<2x32xbf16>,
    %89 = arith.truncf %86 : vector<2x32xf32> to vector<2x32xbf16>
    %c0_43 = arith.constant 0 : index
    %c32_44 = arith.constant 32 : index
    %90 = vector.load %arg15[%c0_43, %c32_44] : memref<2x64xbf16, #tpu.memory_space<vmem>>, vector<2x32xbf16>
    tpu.vector_store %arg15[%c0_43, %c32_44], %89 {strides = array<i32>} : memref<2x64xbf16, #tpu.memory_space<vmem>>, vector<2x32xbf16>,
    %c0_45 = arith.constant 0 : index
    %c0_46 = arith.constant 0 : index
    %91 = vector.load %arg15[%c0_45, %c0_46] : memref<2x64xbf16, #tpu.memory_space<vmem>>, vector<2x64xbf16>
    %cst_47 = arith.constant dense<0.000000e+00> : vector<2x256xf32>
    %92 = tpu.matmul %91, %7, %cst_47 {dimension_numbers = #tpu.dot_dimension_numbers<[1], [0], [0], [1], [0, 0, 1, 1], [], []>} : vector<2x64xbf16>, vector<64x256xbf16>, vector<2x256xf32> -> vector<2x256xf32>
    %c4 = arith.constant 4 : index
    %c0_48 = arith.constant 0 : index
    %93 = vector.load %arg13[%c4, %c0_48] : memref<16x128xf32, #tpu.memory_space<vmem>>, vector<2x128xf32>
    %94 = vector.extract_strided_slice %92 {offsets = [0, 0], sizes = [2, 128], strides = [1, 1]} : vector<2x256xf32> to vector<2x128xf32>
    %95 = arith.addf %93, %94 : vector<2x128xf32>
    %96 = vector.extract_strided_slice %95 {offsets = [0, 0], sizes = [2, 96], strides = [1, 1]} : vector<2x128xf32> to vector<2x96xf32>
    %97 = arith.negf %96 : vector<2x96xf32>
    %98 = math.exp %97 : vector<2x96xf32>
    %cst_49 = arith.constant 1.000000e+00 : f32
    %99 = vector.broadcast %cst_49 : f32 to vector<2x96xf32>
    %100 = arith.addf %99, %98 : vector<2x96xf32>
    %101 = arith.divf %99, %100 : vector<2x96xf32>
    %102 = vector.extract_strided_slice %95 {offsets = [0, 96], sizes = [2, 32], strides = [1, 1]} : vector<2x128xf32> to vector<2x32xf32>
    %103 = math.tanh %102 : vector<2x32xf32>
    %104 = vector.extract_strided_slice %101 {offsets = [0, 0], sizes = [2, 32], strides = [1, 1]} : vector<2x96xf32> to vector<2x32xf32>
    %105 = vector.extract_strided_slice %101 {offsets = [0, 32], sizes = [2, 32], strides = [1, 1]} : vector<2x96xf32> to vector<2x32xf32>
    %106 = vector.extract_strided_slice %101 {offsets = [0, 64], sizes = [2, 32], strides = [1, 1]} : vector<2x96xf32> to vector<2x32xf32>
    %107 = arith.mulf %105, %64 : vector<2x32xf32>
    %108 = arith.mulf %104, %103 : vector<2x32xf32>
    %109 = arith.addf %107, %108 : vector<2x32xf32>
    %110 = math.tanh %109 : vector<2x32xf32>
    %111 = arith.mulf %106, %110 : vector<2x32xf32>
    %112 = arith.truncf %111 : vector<2x32xf32> to vector<2x32xbf16>
    %c0_50 = arith.constant 0 : index
    %c0_51 = arith.constant 0 : index
    %113 = vector.load %arg15[%c0_50, %c0_51] : memref<2x64xbf16, #tpu.memory_space<vmem>>, vector<2x32xbf16>
    tpu.vector_store %arg15[%c0_50, %c0_51], %112 {strides = array<i32>} : memref<2x64xbf16, #tpu.memory_space<vmem>>, vector<2x32xbf16>,
    %114 = vector.extract_strided_slice %92 {offsets = [0, 128], sizes = [2, 128], strides = [1, 1]} : vector<2x256xf32> to vector<2x128xf32>
    %115 = arith.addf %114, %10 : vector<2x128xf32>
    %116 = vector.extract_strided_slice %115 {offsets = [0, 0], sizes = [2, 96], strides = [1, 1]} : vector<2x128xf32> to vector<2x96xf32>
    %117 = arith.negf %116 : vector<2x96xf32>
    %118 = math.exp %117 : vector<2x96xf32>
    %cst_52 = arith.constant 1.000000e+00 : f32
    %119 = vector.broadcast %cst_52 : f32 to vector<2x96xf32>
    %120 = arith.addf %119, %118 : vector<2x96xf32>
    %121 = arith.divf %119, %120 : vector<2x96xf32>
    %122 = vector.extract_strided_slice %115 {offsets = [0, 96], sizes = [2, 32], strides = [1, 1]} : vector<2x128xf32> to vector<2x32xf32>
    %123 = math.tanh %122 : vector<2x32xf32>
    %124 = vector.extract_strided_slice %121 {offsets = [0, 0], sizes = [2, 32], strides = [1, 1]} : vector<2x96xf32> to vector<2x32xf32>
    %125 = vector.extract_strided_slice %121 {offsets = [0, 32], sizes = [2, 32], strides = [1, 1]} : vector<2x96xf32> to vector<2x32xf32>
    %126 = vector.extract_strided_slice %121 {offsets = [0, 64], sizes = [2, 32], strides = [1, 1]} : vector<2x96xf32> to vector<2x32xf32>
    %127 = arith.mulf %125, %84 : vector<2x32xf32>
    %128 = arith.mulf %124, %123 : vector<2x32xf32>
    %129 = arith.addf %127, %128 : vector<2x32xf32>
    %130 = math.tanh %129 : vector<2x32xf32>
    %131 = arith.mulf %126, %130 : vector<2x32xf32>
    %132 = arith.truncf %131 : vector<2x32xf32> to vector<2x32xbf16>
    %c2_53 = arith.constant 2 : index
    %c0_54 = arith.constant 0 : index
    %133 = vector.load %arg14[%c2_53, %c0_54] : memref<16x32xbf16, #tpu.memory_space<vmem>>, vector<2x32xbf16>
    tpu.vector_store %arg14[%c2_53, %c0_54], %132 {strides = array<i32>} : memref<16x32xbf16, #tpu.memory_space<vmem>>, vector<2x32xbf16>,
    %134 = arith.truncf %131 : vector<2x32xf32> to vector<2x32xbf16>
    %c0_55 = arith.constant 0 : index
    %c32_56 = arith.constant 32 : index
    %135 = vector.load %arg15[%c0_55, %c32_56] : memref<2x64xbf16, #tpu.memory_space<vmem>>, vector<2x32xbf16>
    tpu.vector_store %arg15[%c0_55, %c32_56], %134 {strides = array<i32>} : memref<2x64xbf16, #tpu.memory_space<vmem>>, vector<2x32xbf16>,
    %c0_57 = arith.constant 0 : index
    %c0_58 = arith.constant 0 : index
    %136 = vector.load %arg15[%c0_57, %c0_58] : memref<2x64xbf16, #tpu.memory_space<vmem>>, vector<2x64xbf16>
    %cst_59 = arith.constant dense<0.000000e+00> : vector<2x256xf32>
    %137 = tpu.matmul %136, %7, %cst_59 {dimension_numbers = #tpu.dot_dimension_numbers<[1], [0], [0], [1], [0, 0, 1, 1], [], []>} : vector<2x64xbf16>, vector<64x256xbf16>, vector<2x256xf32> -> vector<2x256xf32>
    %c6 = arith.constant 6 : index
    %c0_60 = arith.constant 0 : index
    %138 = vector.load %arg13[%c6, %c0_60] : memref<16x128xf32, #tpu.memory_space<vmem>>, vector<2x128xf32>
    %139 = vector.extract_strided_slice %137 {offsets = [0, 0], sizes = [2, 128], strides = [1, 1]} : vector<2x256xf32> to vector<2x128xf32>
    %140 = arith.addf %138, %139 : vector<2x128xf32>
    %141 = vector.extract_strided_slice %140 {offsets = [0, 0], sizes = [2, 96], strides = [1, 1]} : vector<2x128xf32> to vector<2x96xf32>
    %142 = arith.negf %141 : vector<2x96xf32>
    %143 = math.exp %142 : vector<2x96xf32>
    %cst_61 = arith.constant 1.000000e+00 : f32
    %144 = vector.broadcast %cst_61 : f32 to vector<2x96xf32>
    %145 = arith.addf %144, %143 : vector<2x96xf32>
    %146 = arith.divf %144, %145 : vector<2x96xf32>
    %147 = vector.extract_strided_slice %140 {offsets = [0, 96], sizes = [2, 32], strides = [1, 1]} : vector<2x128xf32> to vector<2x32xf32>
    %148 = math.tanh %147 : vector<2x32xf32>
    %149 = vector.extract_strided_slice %146 {offsets = [0, 0], sizes = [2, 32], strides = [1, 1]} : vector<2x96xf32> to vector<2x32xf32>
    %150 = vector.extract_strided_slice %146 {offsets = [0, 32], sizes = [2, 32], strides = [1, 1]} : vector<2x96xf32> to vector<2x32xf32>
    %151 = vector.extract_strided_slice %146 {offsets = [0, 64], sizes = [2, 32], strides = [1, 1]} : vector<2x96xf32> to vector<2x32xf32>
    %152 = arith.mulf %150, %109 : vector<2x32xf32>
    %153 = arith.mulf %149, %148 : vector<2x32xf32>
    %154 = arith.addf %152, %153 : vector<2x32xf32>
    %155 = math.tanh %154 : vector<2x32xf32>
    %156 = arith.mulf %151, %155 : vector<2x32xf32>
    %157 = arith.truncf %156 : vector<2x32xf32> to vector<2x32xbf16>
    %c0_62 = arith.constant 0 : index
    %c0_63 = arith.constant 0 : index
    %158 = vector.load %arg15[%c0_62, %c0_63] : memref<2x64xbf16, #tpu.memory_space<vmem>>, vector<2x32xbf16>
    tpu.vector_store %arg15[%c0_62, %c0_63], %157 {strides = array<i32>} : memref<2x64xbf16, #tpu.memory_space<vmem>>, vector<2x32xbf16>,
    %159 = vector.extract_strided_slice %137 {offsets = [0, 128], sizes = [2, 128], strides = [1, 1]} : vector<2x256xf32> to vector<2x128xf32>
    %160 = arith.addf %159, %10 : vector<2x128xf32>
    %161 = vector.extract_strided_slice %160 {offsets = [0, 0], sizes = [2, 96], strides = [1, 1]} : vector<2x128xf32> to vector<2x96xf32>
    %162 = arith.negf %161 : vector<2x96xf32>
    %163 = math.exp %162 : vector<2x96xf32>
    %cst_64 = arith.constant 1.000000e+00 : f32
    %164 = vector.broadcast %cst_64 : f32 to vector<2x96xf32>
    %165 = arith.addf %164, %163 : vector<2x96xf32>
    %166 = arith.divf %164, %165 : vector<2x96xf32>
    %167 = vector.extract_strided_slice %160 {offsets = [0, 96], sizes = [2, 32], strides = [1, 1]} : vector<2x128xf32> to vector<2x32xf32>
    %168 = math.tanh %167 : vector<2x32xf32>
    %169 = vector.extract_strided_slice %166 {offsets = [0, 0], sizes = [2, 32], strides = [1, 1]} : vector<2x96xf32> to vector<2x32xf32>
    %170 = vector.extract_strided_slice %166 {offsets = [0, 32], sizes = [2, 32], strides = [1, 1]} : vector<2x96xf32> to vector<2x32xf32>
    %171 = vector.extract_strided_slice %166 {offsets = [0, 64], sizes = [2, 32], strides = [1, 1]} : vector<2x96xf32> to vector<2x32xf32>
    %172 = arith.mulf %170, %129 : vector<2x32xf32>
    %173 = arith.mulf %169, %168 : vector<2x32xf32>
    %174 = arith.addf %172, %173 : vector<2x32xf32>
    %175 = math.tanh %174 : vector<2x32xf32>
    %176 = arith.mulf %171, %175 : vector<2x32xf32>
    %177 = arith.truncf %176 : vector<2x32xf32> to vector<2x32xbf16>
    %c4_65 = arith.constant 4 : index
    %c0_66 = arith.constant 0 : index
    %178 = vector.load %arg14[%c4_65, %c0_66] : memref<16x32xbf16, #tpu.memory_space<vmem>>, vector<2x32xbf16>
    tpu.vector_store %arg14[%c4_65, %c0_66], %177 {strides = array<i32>} : memref<16x32xbf16, #tpu.memory_space<vmem>>, vector<2x32xbf16>,
    %179 = arith.truncf %176 : vector<2x32xf32> to vector<2x32xbf16>
    %c0_67 = arith.constant 0 : index
    %c32_68 = arith.constant 32 : index
    %180 = vector.load %arg15[%c0_67, %c32_68] : memref<2x64xbf16, #tpu.memory_space<vmem>>, vector<2x32xbf16>
    tpu.vector_store %arg15[%c0_67, %c32_68], %179 {strides = array<i32>} : memref<2x64xbf16, #tpu.memory_space<vmem>>, vector<2x32xbf16>,
    %c0_69 = arith.constant 0 : index
    %c0_70 = arith.constant 0 : index
    %181 = vector.load %arg15[%c0_69, %c0_70] : memref<2x64xbf16, #tpu.memory_space<vmem>>, vector<2x64xbf16>
    %cst_71 = arith.constant dense<0.000000e+00> : vector<2x256xf32>
    %182 = tpu.matmul %181, %7, %cst_71 {dimension_numbers = #tpu.dot_dimension_numbers<[1], [0], [0], [1], [0, 0, 1, 1], [], []>} : vector<2x64xbf16>, vector<64x256xbf16>, vector<2x256xf32> -> vector<2x256xf32>
    %c8 = arith.constant 8 : index
    %c0_72 = arith.constant 0 : index
    %183 = vector.load %arg13[%c8, %c0_72] : memref<16x128xf32, #tpu.memory_space<vmem>>, vector<2x128xf32>
    %184 = vector.extract_strided_slice %182 {offsets = [0, 0], sizes = [2, 128], strides = [1, 1]} : vector<2x256xf32> to vector<2x128xf32>
    %185 = arith.addf %183, %184 : vector<2x128xf32>
    %186 = vector.extract_strided_slice %185 {offsets = [0, 0], sizes = [2, 96], strides = [1, 1]} : vector<2x128xf32> to vector<2x96xf32>
    %187 = arith.negf %186 : vector<2x96xf32>
    %188 = math.exp %187 : vector<2x96xf32>
    %cst_73 = arith.constant 1.000000e+00 : f32
    %189 = vector.broadcast %cst_73 : f32 to vector<2x96xf32>
    %190 = arith.addf %189, %188 : vector<2x96xf32>
    %191 = arith.divf %189, %190 : vector<2x96xf32>
    %192 = vector.extract_strided_slice %185 {offsets = [0, 96], sizes = [2, 32], strides = [1, 1]} : vector<2x128xf32> to vector<2x32xf32>
    %193 = math.tanh %192 : vector<2x32xf32>
    %194 = vector.extract_strided_slice %191 {offsets = [0, 0], sizes = [2, 32], strides = [1, 1]} : vector<2x96xf32> to vector<2x32xf32>
    %195 = vector.extract_strided_slice %191 {offsets = [0, 32], sizes = [2, 32], strides = [1, 1]} : vector<2x96xf32> to vector<2x32xf32>
    %196 = vector.extract_strided_slice %191 {offsets = [0, 64], sizes = [2, 32], strides = [1, 1]} : vector<2x96xf32> to vector<2x32xf32>
    %197 = arith.mulf %195, %154 : vector<2x32xf32>
    %198 = arith.mulf %194, %193 : vector<2x32xf32>
    %199 = arith.addf %197, %198 : vector<2x32xf32>
    %200 = math.tanh %199 : vector<2x32xf32>
    %201 = arith.mulf %196, %200 : vector<2x32xf32>
    %202 = arith.truncf %201 : vector<2x32xf32> to vector<2x32xbf16>
    %c0_74 = arith.constant 0 : index
    %c0_75 = arith.constant 0 : index
    %203 = vector.load %arg15[%c0_74, %c0_75] : memref<2x64xbf16, #tpu.memory_space<vmem>>, vector<2x32xbf16>
    tpu.vector_store %arg15[%c0_74, %c0_75], %202 {strides = array<i32>} : memref<2x64xbf16, #tpu.memory_space<vmem>>, vector<2x32xbf16>,
    %204 = vector.extract_strided_slice %182 {offsets = [0, 128], sizes = [2, 128], strides = [1, 1]} : vector<2x256xf32> to vector<2x128xf32>
    %205 = arith.addf %204, %10 : vector<2x128xf32>
    %206 = vector.extract_strided_slice %205 {offsets = [0, 0], sizes = [2, 96], strides = [1, 1]} : vector<2x128xf32> to vector<2x96xf32>
    %207 = arith.negf %206 : vector<2x96xf32>
    %208 = math.exp %207 : vector<2x96xf32>
    %cst_76 = arith.constant 1.000000e+00 : f32
    %209 = vector.broadcast %cst_76 : f32 to vector<2x96xf32>
    %210 = arith.addf %209, %208 : vector<2x96xf32>
    %211 = arith.divf %209, %210 : vector<2x96xf32>
    %212 = vector.extract_strided_slice %205 {offsets = [0, 96], sizes = [2, 32], strides = [1, 1]} : vector<2x128xf32> to vector<2x32xf32>
    %213 = math.tanh %212 : vector<2x32xf32>
    %214 = vector.extract_strided_slice %211 {offsets = [0, 0], sizes = [2, 32], strides = [1, 1]} : vector<2x96xf32> to vector<2x32xf32>
    %215 = vector.extract_strided_slice %211 {offsets = [0, 32], sizes = [2, 32], strides = [1, 1]} : vector<2x96xf32> to vector<2x32xf32>
    %216 = vector.extract_strided_slice %211 {offsets = [0, 64], sizes = [2, 32], strides = [1, 1]} : vector<2x96xf32> to vector<2x32xf32>
    %217 = arith.mulf %215, %174 : vector<2x32xf32>
    %218 = arith.mulf %214, %213 : vector<2x32xf32>
    %219 = arith.addf %217, %218 : vector<2x32xf32>
    %220 = math.tanh %219 : vector<2x32xf32>
    %221 = arith.mulf %216, %220 : vector<2x32xf32>
    %222 = arith.truncf %221 : vector<2x32xf32> to vector<2x32xbf16>
    %c6_77 = arith.constant 6 : index
    %c0_78 = arith.constant 0 : index
    %223 = vector.load %arg14[%c6_77, %c0_78] : memref<16x32xbf16, #tpu.memory_space<vmem>>, vector<2x32xbf16>
    tpu.vector_store %arg14[%c6_77, %c0_78], %222 {strides = array<i32>} : memref<16x32xbf16, #tpu.memory_space<vmem>>, vector<2x32xbf16>,
    %224 = arith.truncf %221 : vector<2x32xf32> to vector<2x32xbf16>
    %c0_79 = arith.constant 0 : index
    %c32_80 = arith.constant 32 : index
    %225 = vector.load %arg15[%c0_79, %c32_80] : memref<2x64xbf16, #tpu.memory_space<vmem>>, vector<2x32xbf16>
    tpu.vector_store %arg15[%c0_79, %c32_80], %224 {strides = array<i32>} : memref<2x64xbf16, #tpu.memory_space<vmem>>, vector<2x32xbf16>,
    %c0_81 = arith.constant 0 : index
    %c0_82 = arith.constant 0 : index
    %226 = vector.load %arg15[%c0_81, %c0_82] : memref<2x64xbf16, #tpu.memory_space<vmem>>, vector<2x64xbf16>
    %cst_83 = arith.constant dense<0.000000e+00> : vector<2x256xf32>
    %227 = tpu.matmul %226, %7, %cst_83 {dimension_numbers = #tpu.dot_dimension_numbers<[1], [0], [0], [1], [0, 0, 1, 1], [], []>} : vector<2x64xbf16>, vector<64x256xbf16>, vector<2x256xf32> -> vector<2x256xf32>
    %c10 = arith.constant 10 : index
    %c0_84 = arith.constant 0 : index
    %228 = vector.load %arg13[%c10, %c0_84] : memref<16x128xf32, #tpu.memory_space<vmem>>, vector<2x128xf32>
    %229 = vector.extract_strided_slice %227 {offsets = [0, 0], sizes = [2, 128], strides = [1, 1]} : vector<2x256xf32> to vector<2x128xf32>
    %230 = arith.addf %228, %229 : vector<2x128xf32>
    %231 = vector.extract_strided_slice %230 {offsets = [0, 0], sizes = [2, 96], strides = [1, 1]} : vector<2x128xf32> to vector<2x96xf32>
    %232 = arith.negf %231 : vector<2x96xf32>
    %233 = math.exp %232 : vector<2x96xf32>
    %cst_85 = arith.constant 1.000000e+00 : f32
    %234 = vector.broadcast %cst_85 : f32 to vector<2x96xf32>
    %235 = arith.addf %234, %233 : vector<2x96xf32>
    %236 = arith.divf %234, %235 : vector<2x96xf32>
    %237 = vector.extract_strided_slice %230 {offsets = [0, 96], sizes = [2, 32], strides = [1, 1]} : vector<2x128xf32> to vector<2x32xf32>
    %238 = math.tanh %237 : vector<2x32xf32>
    %239 = vector.extract_strided_slice %236 {offsets = [0, 0], sizes = [2, 32], strides = [1, 1]} : vector<2x96xf32> to vector<2x32xf32>
    %240 = vector.extract_strided_slice %236 {offsets = [0, 32], sizes = [2, 32], strides = [1, 1]} : vector<2x96xf32> to vector<2x32xf32>
    %241 = vector.extract_strided_slice %236 {offsets = [0, 64], sizes = [2, 32], strides = [1, 1]} : vector<2x96xf32> to vector<2x32xf32>
    %242 = arith.mulf %240, %199 : vector<2x32xf32>
    %243 = arith.mulf %239, %238 : vector<2x32xf32>
    %244 = arith.addf %242, %243 : vector<2x32xf32>
    %245 = math.tanh %244 : vector<2x32xf32>
    %246 = arith.mulf %241, %245 : vector<2x32xf32>
    %247 = arith.truncf %246 : vector<2x32xf32> to vector<2x32xbf16>
    %c0_86 = arith.constant 0 : index
    %c0_87 = arith.constant 0 : index
    %248 = vector.load %arg15[%c0_86, %c0_87] : memref<2x64xbf16, #tpu.memory_space<vmem>>, vector<2x32xbf16>
    tpu.vector_store %arg15[%c0_86, %c0_87], %247 {strides = array<i32>} : memref<2x64xbf16, #tpu.memory_space<vmem>>, vector<2x32xbf16>,
    %249 = vector.extract_strided_slice %227 {offsets = [0, 128], sizes = [2, 128], strides = [1, 1]} : vector<2x256xf32> to vector<2x128xf32>
    %250 = arith.addf %249, %10 : vector<2x128xf32>
    %251 = vector.extract_strided_slice %250 {offsets = [0, 0], sizes = [2, 96], strides = [1, 1]} : vector<2x128xf32> to vector<2x96xf32>
    %252 = arith.negf %251 : vector<2x96xf32>
    %253 = math.exp %252 : vector<2x96xf32>
    %cst_88 = arith.constant 1.000000e+00 : f32
    %254 = vector.broadcast %cst_88 : f32 to vector<2x96xf32>
    %255 = arith.addf %254, %253 : vector<2x96xf32>
    %256 = arith.divf %254, %255 : vector<2x96xf32>
    %257 = vector.extract_strided_slice %250 {offsets = [0, 96], sizes = [2, 32], strides = [1, 1]} : vector<2x128xf32> to vector<2x32xf32>
    %258 = math.tanh %257 : vector<2x32xf32>
    %259 = vector.extract_strided_slice %256 {offsets = [0, 0], sizes = [2, 32], strides = [1, 1]} : vector<2x96xf32> to vector<2x32xf32>
    %260 = vector.extract_strided_slice %256 {offsets = [0, 32], sizes = [2, 32], strides = [1, 1]} : vector<2x96xf32> to vector<2x32xf32>
    %261 = vector.extract_strided_slice %256 {offsets = [0, 64], sizes = [2, 32], strides = [1, 1]} : vector<2x96xf32> to vector<2x32xf32>
    %262 = arith.mulf %260, %219 : vector<2x32xf32>
    %263 = arith.mulf %259, %258 : vector<2x32xf32>
    %264 = arith.addf %262, %263 : vector<2x32xf32>
    %265 = math.tanh %264 : vector<2x32xf32>
    %266 = arith.mulf %261, %265 : vector<2x32xf32>
    %267 = arith.truncf %266 : vector<2x32xf32> to vector<2x32xbf16>
    %c8_89 = arith.constant 8 : index
    %c0_90 = arith.constant 0 : index
    %268 = vector.load %arg14[%c8_89, %c0_90] : memref<16x32xbf16, #tpu.memory_space<vmem>>, vector<2x32xbf16>
    tpu.vector_store %arg14[%c8_89, %c0_90], %267 {strides = array<i32>} : memref<16x32xbf16, #tpu.memory_space<vmem>>, vector<2x32xbf16>,
    %269 = arith.truncf %266 : vector<2x32xf32> to vector<2x32xbf16>
    %c0_91 = arith.constant 0 : index
    %c32_92 = arith.constant 32 : index
    %270 = vector.load %arg15[%c0_91, %c32_92] : memref<2x64xbf16, #tpu.memory_space<vmem>>, vector<2x32xbf16>
    tpu.vector_store %arg15[%c0_91, %c32_92], %269 {strides = array<i32>} : memref<2x64xbf16, #tpu.memory_space<vmem>>, vector<2x32xbf16>,
    %c0_93 = arith.constant 0 : index
    %c0_94 = arith.constant 0 : index
    %271 = vector.load %arg15[%c0_93, %c0_94] : memref<2x64xbf16, #tpu.memory_space<vmem>>, vector<2x64xbf16>
    %cst_95 = arith.constant dense<0.000000e+00> : vector<2x256xf32>
    %272 = tpu.matmul %271, %7, %cst_95 {dimension_numbers = #tpu.dot_dimension_numbers<[1], [0], [0], [1], [0, 0, 1, 1], [], []>} : vector<2x64xbf16>, vector<64x256xbf16>, vector<2x256xf32> -> vector<2x256xf32>
    %c12 = arith.constant 12 : index
    %c0_96 = arith.constant 0 : index
    %273 = vector.load %arg13[%c12, %c0_96] : memref<16x128xf32, #tpu.memory_space<vmem>>, vector<2x128xf32>
    %274 = vector.extract_strided_slice %272 {offsets = [0, 0], sizes = [2, 128], strides = [1, 1]} : vector<2x256xf32> to vector<2x128xf32>
    %275 = arith.addf %273, %274 : vector<2x128xf32>
    %276 = vector.extract_strided_slice %275 {offsets = [0, 0], sizes = [2, 96], strides = [1, 1]} : vector<2x128xf32> to vector<2x96xf32>
    %277 = arith.negf %276 : vector<2x96xf32>
    %278 = math.exp %277 : vector<2x96xf32>
    %cst_97 = arith.constant 1.000000e+00 : f32
    %279 = vector.broadcast %cst_97 : f32 to vector<2x96xf32>
    %280 = arith.addf %279, %278 : vector<2x96xf32>
    %281 = arith.divf %279, %280 : vector<2x96xf32>
    %282 = vector.extract_strided_slice %275 {offsets = [0, 96], sizes = [2, 32], strides = [1, 1]} : vector<2x128xf32> to vector<2x32xf32>
    %283 = math.tanh %282 : vector<2x32xf32>
    %284 = vector.extract_strided_slice %281 {offsets = [0, 0], sizes = [2, 32], strides = [1, 1]} : vector<2x96xf32> to vector<2x32xf32>
    %285 = vector.extract_strided_slice %281 {offsets = [0, 32], sizes = [2, 32], strides = [1, 1]} : vector<2x96xf32> to vector<2x32xf32>
    %286 = vector.extract_strided_slice %281 {offsets = [0, 64], sizes = [2, 32], strides = [1, 1]} : vector<2x96xf32> to vector<2x32xf32>
    %287 = arith.mulf %285, %244 : vector<2x32xf32>
    %288 = arith.mulf %284, %283 : vector<2x32xf32>
    %289 = arith.addf %287, %288 : vector<2x32xf32>
    %290 = math.tanh %289 : vector<2x32xf32>
    %291 = arith.mulf %286, %290 : vector<2x32xf32>
    %292 = arith.truncf %291 : vector<2x32xf32> to vector<2x32xbf16>
    %c0_98 = arith.constant 0 : index
    %c0_99 = arith.constant 0 : index
    %293 = vector.load %arg15[%c0_98, %c0_99] : memref<2x64xbf16, #tpu.memory_space<vmem>>, vector<2x32xbf16>
    tpu.vector_store %arg15[%c0_98, %c0_99], %292 {strides = array<i32>} : memref<2x64xbf16, #tpu.memory_space<vmem>>, vector<2x32xbf16>,
    %294 = vector.extract_strided_slice %272 {offsets = [0, 128], sizes = [2, 128], strides = [1, 1]} : vector<2x256xf32> to vector<2x128xf32>
    %295 = arith.addf %294, %10 : vector<2x128xf32>
    %296 = vector.extract_strided_slice %295 {offsets = [0, 0], sizes = [2, 96], strides = [1, 1]} : vector<2x128xf32> to vector<2x96xf32>
    %297 = arith.negf %296 : vector<2x96xf32>
    %298 = math.exp %297 : vector<2x96xf32>
    %cst_100 = arith.constant 1.000000e+00 : f32
    %299 = vector.broadcast %cst_100 : f32 to vector<2x96xf32>
    %300 = arith.addf %299, %298 : vector<2x96xf32>
    %301 = arith.divf %299, %300 : vector<2x96xf32>
    %302 = vector.extract_strided_slice %295 {offsets = [0, 96], sizes = [2, 32], strides = [1, 1]} : vector<2x128xf32> to vector<2x32xf32>
    %303 = math.tanh %302 : vector<2x32xf32>
    %304 = vector.extract_strided_slice %301 {offsets = [0, 0], sizes = [2, 32], strides = [1, 1]} : vector<2x96xf32> to vector<2x32xf32>
    %305 = vector.extract_strided_slice %301 {offsets = [0, 32], sizes = [2, 32], strides = [1, 1]} : vector<2x96xf32> to vector<2x32xf32>
    %306 = vector.extract_strided_slice %301 {offsets = [0, 64], sizes = [2, 32], strides = [1, 1]} : vector<2x96xf32> to vector<2x32xf32>
    %307 = arith.mulf %305, %264 : vector<2x32xf32>
    %308 = arith.mulf %304, %303 : vector<2x32xf32>
    %309 = arith.addf %307, %308 : vector<2x32xf32>
    %310 = math.tanh %309 : vector<2x32xf32>
    %311 = arith.mulf %306, %310 : vector<2x32xf32>
    %312 = arith.truncf %311 : vector<2x32xf32> to vector<2x32xbf16>
    %c10_101 = arith.constant 10 : index
    %c0_102 = arith.constant 0 : index
    %313 = vector.load %arg14[%c10_101, %c0_102] : memref<16x32xbf16, #tpu.memory_space<vmem>>, vector<2x32xbf16>
    tpu.vector_store %arg14[%c10_101, %c0_102], %312 {strides = array<i32>} : memref<16x32xbf16, #tpu.memory_space<vmem>>, vector<2x32xbf16>,
    %314 = arith.truncf %311 : vector<2x32xf32> to vector<2x32xbf16>
    %c0_103 = arith.constant 0 : index
    %c32_104 = arith.constant 32 : index
    %315 = vector.load %arg15[%c0_103, %c32_104] : memref<2x64xbf16, #tpu.memory_space<vmem>>, vector<2x32xbf16>
    tpu.vector_store %arg15[%c0_103, %c32_104], %314 {strides = array<i32>} : memref<2x64xbf16, #tpu.memory_space<vmem>>, vector<2x32xbf16>,
    %c0_105 = arith.constant 0 : index
    %c0_106 = arith.constant 0 : index
    %316 = vector.load %arg15[%c0_105, %c0_106] : memref<2x64xbf16, #tpu.memory_space<vmem>>, vector<2x64xbf16>
    %cst_107 = arith.constant dense<0.000000e+00> : vector<2x256xf32>
    %317 = tpu.matmul %316, %7, %cst_107 {dimension_numbers = #tpu.dot_dimension_numbers<[1], [0], [0], [1], [0, 0, 1, 1], [], []>} : vector<2x64xbf16>, vector<64x256xbf16>, vector<2x256xf32> -> vector<2x256xf32>
    %c14 = arith.constant 14 : index
    %c0_108 = arith.constant 0 : index
    %318 = vector.load %arg13[%c14, %c0_108] : memref<16x128xf32, #tpu.memory_space<vmem>>, vector<2x128xf32>
    %319 = vector.extract_strided_slice %317 {offsets = [0, 0], sizes = [2, 128], strides = [1, 1]} : vector<2x256xf32> to vector<2x128xf32>
    %320 = arith.addf %318, %319 : vector<2x128xf32>
    %321 = vector.extract_strided_slice %320 {offsets = [0, 0], sizes = [2, 96], strides = [1, 1]} : vector<2x128xf32> to vector<2x96xf32>
    %322 = arith.negf %321 : vector<2x96xf32>
    %323 = math.exp %322 : vector<2x96xf32>
    %cst_109 = arith.constant 1.000000e+00 : f32
    %324 = vector.broadcast %cst_109 : f32 to vector<2x96xf32>
    %325 = arith.addf %324, %323 : vector<2x96xf32>
    %326 = arith.divf %324, %325 : vector<2x96xf32>
    %327 = vector.extract_strided_slice %320 {offsets = [0, 96], sizes = [2, 32], strides = [1, 1]} : vector<2x128xf32> to vector<2x32xf32>
    %328 = math.tanh %327 : vector<2x32xf32>
    %329 = vector.extract_strided_slice %326 {offsets = [0, 0], sizes = [2, 32], strides = [1, 1]} : vector<2x96xf32> to vector<2x32xf32>
    %330 = vector.extract_strided_slice %326 {offsets = [0, 32], sizes = [2, 32], strides = [1, 1]} : vector<2x96xf32> to vector<2x32xf32>
    %331 = vector.extract_strided_slice %326 {offsets = [0, 64], sizes = [2, 32], strides = [1, 1]} : vector<2x96xf32> to vector<2x32xf32>
    %332 = arith.mulf %330, %289 : vector<2x32xf32>
    %333 = arith.mulf %329, %328 : vector<2x32xf32>
    %334 = arith.addf %332, %333 : vector<2x32xf32>
    %335 = math.tanh %334 : vector<2x32xf32>
    %336 = arith.mulf %331, %335 : vector<2x32xf32>
    %337 = arith.truncf %336 : vector<2x32xf32> to vector<2x32xbf16>
    %c0_110 = arith.constant 0 : index
    %c0_111 = arith.constant 0 : index
    %338 = vector.load %arg15[%c0_110, %c0_111] : memref<2x64xbf16, #tpu.memory_space<vmem>>, vector<2x32xbf16>
    tpu.vector_store %arg15[%c0_110, %c0_111], %337 {strides = array<i32>} : memref<2x64xbf16, #tpu.memory_space<vmem>>, vector<2x32xbf16>,
    %339 = vector.extract_strided_slice %317 {offsets = [0, 128], sizes = [2, 128], strides = [1, 1]} : vector<2x256xf32> to vector<2x128xf32>
    %340 = arith.addf %339, %10 : vector<2x128xf32>
    %341 = vector.extract_strided_slice %340 {offsets = [0, 0], sizes = [2, 96], strides = [1, 1]} : vector<2x128xf32> to vector<2x96xf32>
    %342 = arith.negf %341 : vector<2x96xf32>
    %343 = math.exp %342 : vector<2x96xf32>
    %cst_112 = arith.constant 1.000000e+00 : f32
    %344 = vector.broadcast %cst_112 : f32 to vector<2x96xf32>
    %345 = arith.addf %344, %343 : vector<2x96xf32>
    %346 = arith.divf %344, %345 : vector<2x96xf32>
    %347 = vector.extract_strided_slice %340 {offsets = [0, 96], sizes = [2, 32], strides = [1, 1]} : vector<2x128xf32> to vector<2x32xf32>
    %348 = math.tanh %347 : vector<2x32xf32>
    %349 = vector.extract_strided_slice %346 {offsets = [0, 0], sizes = [2, 32], strides = [1, 1]} : vector<2x96xf32> to vector<2x32xf32>
    %350 = vector.extract_strided_slice %346 {offsets = [0, 32], sizes = [2, 32], strides = [1, 1]} : vector<2x96xf32> to vector<2x32xf32>
    %351 = vector.extract_strided_slice %346 {offsets = [0, 64], sizes = [2, 32], strides = [1, 1]} : vector<2x96xf32> to vector<2x32xf32>
    %352 = arith.mulf %350, %309 : vector<2x32xf32>
    %353 = arith.mulf %349, %348 : vector<2x32xf32>
    %354 = arith.addf %352, %353 : vector<2x32xf32>
    %355 = math.tanh %354 : vector<2x32xf32>
    %356 = arith.mulf %351, %355 : vector<2x32xf32>
    %357 = arith.truncf %356 : vector<2x32xf32> to vector<2x32xbf16>
    %c12_113 = arith.constant 12 : index
    %c0_114 = arith.constant 0 : index
    %358 = vector.load %arg14[%c12_113, %c0_114] : memref<16x32xbf16, #tpu.memory_space<vmem>>, vector<2x32xbf16>
    tpu.vector_store %arg14[%c12_113, %c0_114], %357 {strides = array<i32>} : memref<16x32xbf16, #tpu.memory_space<vmem>>, vector<2x32xbf16>,
    %359 = arith.truncf %356 : vector<2x32xf32> to vector<2x32xbf16>
    %c0_115 = arith.constant 0 : index
    %c32_116 = arith.constant 32 : index
    %360 = vector.load %arg15[%c0_115, %c32_116] : memref<2x64xbf16, #tpu.memory_space<vmem>>, vector<2x32xbf16>
    tpu.vector_store %arg15[%c0_115, %c32_116], %359 {strides = array<i32>} : memref<2x64xbf16, #tpu.memory_space<vmem>>, vector<2x32xbf16>,
    %c0_117 = arith.constant 0 : index
    %c0_118 = arith.constant 0 : index
    %361 = vector.load %arg15[%c0_117, %c0_118] : memref<2x64xbf16, #tpu.memory_space<vmem>>, vector<2x64xbf16>
    %cst_119 = arith.constant dense<0.000000e+00> : vector<2x256xf32>
    %362 = tpu.matmul %361, %7, %cst_119 {dimension_numbers = #tpu.dot_dimension_numbers<[1], [0], [0], [1], [0, 0, 1, 1], [], []>} : vector<2x64xbf16>, vector<64x256xbf16>, vector<2x256xf32> -> vector<2x256xf32>
    %363 = vector.extract_strided_slice %362 {offsets = [0, 128], sizes = [2, 128], strides = [1, 1]} : vector<2x256xf32> to vector<2x128xf32>
    %364 = arith.addf %363, %10 : vector<2x128xf32>
    %365 = vector.extract_strided_slice %364 {offsets = [0, 0], sizes = [2, 96], strides = [1, 1]} : vector<2x128xf32> to vector<2x96xf32>
    %366 = arith.negf %365 : vector<2x96xf32>
    %367 = math.exp %366 : vector<2x96xf32>
    %cst_120 = arith.constant 1.000000e+00 : f32
    %368 = vector.broadcast %cst_120 : f32 to vector<2x96xf32>
    %369 = arith.addf %368, %367 : vector<2x96xf32>
    %370 = arith.divf %368, %369 : vector<2x96xf32>
    %371 = vector.extract_strided_slice %364 {offsets = [0, 96], sizes = [2, 32], strides = [1, 1]} : vector<2x128xf32> to vector<2x32xf32>
    %372 = math.tanh %371 : vector<2x32xf32>
    %373 = vector.extract_strided_slice %370 {offsets = [0, 0], sizes = [2, 32], strides = [1, 1]} : vector<2x96xf32> to vector<2x32xf32>
    %374 = vector.extract_strided_slice %370 {offsets = [0, 32], sizes = [2, 32], strides = [1, 1]} : vector<2x96xf32> to vector<2x32xf32>
    %375 = vector.extract_strided_slice %370 {offsets = [0, 64], sizes = [2, 32], strides = [1, 1]} : vector<2x96xf32> to vector<2x32xf32>
    %376 = arith.mulf %374, %354 : vector<2x32xf32>
    %377 = arith.mulf %373, %372 : vector<2x32xf32>
    %378 = arith.addf %376, %377 : vector<2x32xf32>
    %379 = math.tanh %378 : vector<2x32xf32>
    %380 = arith.mulf %375, %379 : vector<2x32xf32>
    %381 = arith.truncf %380 : vector<2x32xf32> to vector<2x32xbf16>
    %c14_121 = arith.constant 14 : index
    %c0_122 = arith.constant 0 : index
    %382 = vector.load %arg14[%c14_121, %c0_122] : memref<16x32xbf16, #tpu.memory_space<vmem>>, vector<2x32xbf16>
    tpu.vector_store %arg14[%c14_121, %c0_122], %381 {strides = array<i32>} : memref<16x32xbf16, #tpu.memory_space<vmem>>, vector<2x32xbf16>,
    %c0_123 = arith.constant 0 : index
    %c0_124 = arith.constant 0 : index
    %c0_125 = arith.constant 0 : index
    %383 = vector.load %arg11[%c0_123, %c0_124, %c0_125] : memref<2x2x32xf32, #tpu.memory_space<vmem>>, vector<1x2x32xf32>
    %384 = vector.shape_cast %383 : vector<1x2x32xf32> to vector<2x32xf32>
    %385 = vector.shape_cast %336 : vector<2x32xf32> to vector<1x2x32xf32>
    tpu.vector_store %arg11[%c0_123, %c0_124, %c0_125], %385 {strides = array<i32>} : memref<2x2x32xf32, #tpu.memory_space<vmem>>, vector<1x2x32xf32>,
    %c1_126 = arith.constant 1 : index
    %c0_127 = arith.constant 0 : index
    %c0_128 = arith.constant 0 : index
    %386 = vector.load %arg11[%c1_126, %c0_127, %c0_128] : memref<2x2x32xf32, #tpu.memory_space<vmem>>, vector<1x2x32xf32>
    %387 = vector.shape_cast %386 : vector<1x2x32xf32> to vector<2x32xf32>
    %388 = vector.shape_cast %380 : vector<2x32xf32> to vector<1x2x32xf32>
    tpu.vector_store %arg11[%c1_126, %c0_127, %c0_128], %388 {strides = array<i32>} : memref<2x2x32xf32, #tpu.memory_space<vmem>>, vector<1x2x32xf32>,
    %c0_129 = arith.constant 0 : index
    %c0_130 = arith.constant 0 : index
    %c0_131 = arith.constant 0 : index
    %389 = vector.load %arg12[%c0_129, %c0_130, %c0_131] : memref<2x2x32xf32, #tpu.memory_space<vmem>>, vector<1x2x32xf32>
    %390 = vector.shape_cast %389 : vector<1x2x32xf32> to vector<2x32xf32>
    %391 = vector.shape_cast %334 : vector<2x32xf32> to vector<1x2x32xf32>
    tpu.vector_store %arg12[%c0_129, %c0_130, %c0_131], %391 {strides = array<i32>} : memref<2x2x32xf32, #tpu.memory_space<vmem>>, vector<1x2x32xf32>,
    %c1_132 = arith.constant 1 : index
    %c0_133 = arith.constant 0 : index
    %c0_134 = arith.constant 0 : index
    %392 = vector.load %arg12[%c1_132, %c0_133, %c0_134] : memref<2x2x32xf32, #tpu.memory_space<vmem>>, vector<1x2x32xf32>
    %393 = vector.shape_cast %392 : vector<1x2x32xf32> to vector<2x32xf32>
    %394 = vector.shape_cast %378 : vector<2x32xf32> to vector<1x2x32xf32>
    tpu.vector_store %arg12[%c1_132, %c0_133, %c0_134], %394 {strides = array<i32>} : memref<2x2x32xf32, #tpu.memory_space<vmem>>, vector<1x2x32xf32>,
    %c0_135 = arith.constant 0 : index
    %c0_136 = arith.constant 0 : index
    %395 = vector.load %arg14[%c0_135, %c0_136] : memref<16x32xbf16, #tpu.memory_space<vmem>>, vector<16x32xbf16>
    %c0_137 = arith.constant 0 : index
    %c0_138 = arith.constant 0 : index
    %396 = vector.load %arg8[%c0_137, %c0_138] : memref<32x128xbf16, #tpu.memory_space<vmem>>, vector<32x128xbf16>
    %cst_139 = arith.constant dense<0.000000e+00> : vector<16x128xf32>
    %397 = tpu.matmul %395, %396, %cst_139 {dimension_numbers = #tpu.dot_dimension_numbers<[1], [0], [0], [1], [0, 0, 1, 1], [], []>} : vector<16x32xbf16>, vector<32x128xbf16>, vector<16x128xf32> -> vector<16x128xf32>
    %c0_140 = arith.constant 0 : index
    %c0_141 = arith.constant 0 : index
    %398 = vector.load %arg9[%c0_140, %c0_141] : memref<1x128xf32, #tpu.memory_space<vmem>>, vector<1x128xf32>
    %399 = vector.broadcast %398 : vector<1x128xf32> to vector<16x128xf32>
    %400 = arith.addf %397, %399 : vector<16x128xf32>
    %c0_142 = arith.constant 0 : index
    %c0_143 = arith.constant 0 : index
    %401 = vector.load %arg10[%c0_142, %c0_143] : memref<16x128xf32, #tpu.memory_space<vmem>>, vector<16x128xf32>
    tpu.vector_store %arg10[%c0_142, %c0_143], %400 {strides = array<i32>} : memref<16x128xf32, #tpu.memory_space<vmem>>, vector<16x128xf32>,
    return
  }
  func.func @transform_0(%arg0: i32) -> (i32, i32) {
    %c0_i32 = arith.constant 0 : i32
    %c0_i32_0 = arith.constant 0 : i32
    %c0_i32_1 = arith.constant 0 : i32
    return %c0_i32, %c0_i32_0 : i32, i32
  }
  func.func @transform_1(%arg0: i32) -> (i32, i32, i32) {
    %c0_i32 = arith.constant 0 : i32
    %c0_i32_0 = arith.constant 0 : i32
    %c0_i32_1 = arith.constant 0 : i32
    %c0_i32_2 = arith.constant 0 : i32
    return %c0_i32, %c0_i32_0, %c0_i32_1 : i32, i32, i32
  }
  func.func @transform_2(%arg0: i32) -> (i32, i32, i32) {
    %c0_i32 = arith.constant 0 : i32
    %c0_i32_0 = arith.constant 0 : i32
    %c0_i32_1 = arith.constant 0 : i32
    %c0_i32_2 = arith.constant 0 : i32
    return %c0_i32, %c0_i32_0, %c0_i32_1 : i32, i32, i32
  }
  func.func @transform_3(%arg0: i32) -> (i32, i32) {
    %c0_i32 = arith.constant 0 : i32
    %c0_i32_0 = arith.constant 0 : i32
    %c0_i32_1 = arith.constant 0 : i32
    return %c0_i32, %c0_i32_0 : i32, i32
  }
  func.func @transform_4(%arg0: i32) -> (i32, i32) {
    %c0_i32 = arith.constant 0 : i32
    %c0_i32_0 = arith.constant 0 : i32
    %c0_i32_1 = arith.constant 0 : i32
    return %c0_i32, %c0_i32_0 : i32, i32
  }
  func.func @transform_5(%arg0: i32) -> (i32, i32) {
    %c0_i32 = arith.constant 0 : i32
    %c0_i32_0 = arith.constant 0 : i32
    %c0_i32_1 = arith.constant 0 : i32
    return %c0_i32, %c0_i32_0 : i32, i32
  }
  func.func @transform_6(%arg0: i32) -> (i32, i32) {
    %c0_i32 = arith.constant 0 : i32
    %c0_i32_0 = arith.constant 0 : i32
    %c0_i32_1 = arith.constant 0 : i32
    return %c0_i32, %c0_i32_0 : i32, i32
  }
  func.func @transform_7(%arg0: i32) -> (i32, i32) {
    %c0_i32 = arith.constant 0 : i32
    %c0_i32_0 = arith.constant 0 : i32
    %c0_i32_1 = arith.constant 0 : i32
    return %c0_i32, %c0_i32_0 : i32, i32
  }
  func.func @transform_8(%arg0: i32) -> (i32, i32) {
    %c0_i32 = arith.constant 0 : i32
    %c0_i32_0 = arith.constant 0 : i32
    %c0_i32_1 = arith.constant 0 : i32
    return %c0_i32, %c0_i32_0 : i32, i32
  }
  func.func @transform_9(%arg0: i32) -> (i32, i32) {
    %c0_i32 = arith.constant 0 : i32
    %c0_i32_0 = arith.constant 0 : i32
    %c0_i32_1 = arith.constant 0 : i32
    return %c0_i32, %c0_i32_0 : i32, i32
  }
  func.func @transform_10(%arg0: i32) -> (i32, i32, i32) {
    %c0_i32 = arith.constant 0 : i32
    %c0_i32_0 = arith.constant 0 : i32
    %c0_i32_1 = arith.constant 0 : i32
    %c0_i32_2 = arith.constant 0 : i32
    return %c0_i32, %c0_i32_0, %c0_i32_1 : i32, i32, i32
  }
  func.func @transform_11(%arg0: i32) -> (i32, i32, i32) {
    %c0_i32 = arith.constant 0 : i32
    %c0_i32_0 = arith.constant 0 : i32
    %c0_i32_1 = arith.constant 0 : i32
    %c0_i32_2 = arith.constant 0 : i32
    return %c0_i32, %c0_i32_0, %c0_i32_1 : i32, i32, i32
  }
}

</mosaic_0001>

<bundles_post_ra>
// kernel: tpu_custom_call.1
= control target key start
LH: loop header
LB: loop body
LE: loop exit
PB: predicated region body
PF: predicated region fallthrough
CT: control target
= control target key end

     0   :  { %17 = vsyncpa [#allocation6], 0  ;;  %s2492_s0 = inlined_call_operand.hbm [shape: bf16[16,32], index: 0, kind: input, shape index: {}]   ;;  %s2493_s1 = inlined_call_operand.hbm [shape: f32[2,2,32], index: 1, kind: input, shape index: {}]   ;;  %s2494_s2 = inlined_call_operand.vmem [shape: f32[2,2,32], index: 2, kind: input, shape index: {}]   ;;  %s2495_s3 = inlined_call_operand.hbm [shape: bf16[32,128], index: 3, kind: input, shape index: {}]   ;;  %s2496_s4 = inlined_call_operand.vmem [shape: f32[1,128], index: 4, kind: input, shape index: {}]   ;;  %s2497_s5 = inlined_call_operand.hbm [shape: bf16[64,256], index: 5, kind: input, shape index: {}]   ;;  %s2498_s6 = inlined_call_operand.vmem [shape: f32[1,128], index: 6, kind: input, shape index: {}]   ;;  %s2499_s7 = inlined_call_operand.vmem [shape: bf16[32,128], index: 7, kind: input, shape index: {}]   ;;  %s2500_s8 = inlined_call_operand.vmem [shape: f32[1,128], index: 8, kind: input, shape index: {}]   ;;  %s2501_s9 = inlined_call_operand.hbm [shape: f32[16,128], index: 9, kind: output, shape index: {0}]   ;;  %s2502_s10 = inlined_call_operand.hbm [shape: f32[2,2,32], index: 10, kind: output, shape index: {1}]   ;;  %s2503_s11 = inlined_call_operand.hbm [shape: f32[2,2,32], index: 11, kind: output, shape index: {2}]  }
   0x1   :  { %18 = vsyncpa [#allocation9], 0 }
   0x2   :  { %19 = vsyncpa [#allocation12], 0 }
   0x3   :  { %20 = vsyncpa [#allocation7], 0 }
   0x4   :  { %21 = vsyncpa [#allocation15], 0  ;;  %s1959_s17 = smov [#allocation8]   ;;  %s1795_s21 = scalar_lea.hbm %s2493_s1, 64 }
   0x5   :  { %s39_s18 = sshll.u32 %s1959_s17, 4  ;;  %p1796_p0 = scmp.ne.s32.totalorder %s2493_s1, %s1795_s21  ;;  %s40_s18 = int_to_ptr.vmem [resolvable:$true] %s39_s18 }
   0x6   :  { %p1799_p1 = scmp.lt.u32.totalorder %s1795_s21, %s2493_s1 }
   0x8   :  { %p1801_p2 = pnand %p1799_p1, %p1796_p0 }
   0xa   :  { %1804 = shalt.err (!%p1801_p2)
}
   0xb   :  { %s1805_s26 = scalar_lea.vmem %s40_s18, 64  ;;  %p1810_p4 = scmp.lt.s32.totalorder %s40_s18, %s40_s18 }
   0xc   :  { %p1806_p3 = scmp.ne.s32.totalorder %s40_s18, %s1805_s26  ;;  %p1811_p5 = scmp.lt.s32.totalorder %s1805_s26, %s1805_s26 }
   0xe   :  { %p1812_p6 = por %p1811_p5, %p1810_p4 }
  0x10   :  { %p1813_p7 = pnand %p1812_p6, %p1806_p3 }
  0x12   :  { %1816 = shalt.err (!%p1813_p7)
}
  0x13   :  { %s1960_s27 = smov 32   ;;  %s1961_s28 = smov 2  }
  0x14   :  { %45 = dma.hbm_to_vmem [thread:$0]  %s2493_s1, 64, %s40_s18, [#allocation9], %s1960_s27, %s1960_s27, %s1961_s28  }
  0x15   :  { %s1962_s12 = smov [#allocation5]   ;;  %s1817_s16 = scalar_lea.hbm %s2492_s0, 128 }
  0x16   :  { %s27_s13 = sshll.u32 %s1962_s12, 4  ;;  %p1818_p8 = scmp.ne.s32.totalorder %s2492_s0, %s1817_s16  ;;  %s28_s13 = int_to_ptr.vmem [resolvable:$true] %s27_s13 }
  0x17   :  { %p1821_p9 = scmp.lt.u32.totalorder %s1817_s16, %s2492_s0 }
  0x19   :  { %p1823_p10 = pnand %p1821_p9, %p1818_p8 }
  0x1b   :  { %1826 = shalt.err (!%p1823_p10)
}
  0x1c   :  { %s1827_s22 = scalar_lea.vmem %s28_s13, 128  ;;  %p1832_p12 = scmp.lt.s32.totalorder %s28_s13, %s28_s13 }
  0x1d   :  { %p1828_p11 = scmp.ne.s32.totalorder %s28_s13, %s1827_s22  ;;  %p1833_p13 = scmp.lt.s32.totalorder %s1827_s22, %s1827_s22 }
  0x1f   :  { %p1834_p0 = por %p1833_p13, %p1832_p12 }
  0x21   :  { %p1835_p1 = pnand %p1834_p0, %p1828_p11 }
  0x23   :  { %1838 = shalt.err (!%p1835_p1)
}
  0x24   :  { %s1963_s1 = smov 64   ;;  %s1964_s18 = smov 4  }
  0x25   :  { %33 = dma.hbm_to_vmem [thread:$0]  %s2492_s0, 128, %s28_s13, [#allocation6], %s1963_s1, %s1963_s1, %s1964_s18  }
  0x26   :  { %s1965_s25 = smov [#allocation10]   ;;  %s1966_s29 = smov [#allocation11]  }
  0x27   :  { %s53_s26 = sshll.u32 %s1965_s25, 4  ;;  %s67_s30 = sshll.u32 %s1966_s29, 4  ;;  %s54_s26 = int_to_ptr.vmem [resolvable:$true] %s53_s26  ;;  %s2066_s30 = int_to_ptr.vmem [resolvable:$true] %s67_s30 }
  0x28   :  { %s1839_s15 = scalar_lea.hbm %s2495_s3, 256 }
  0x29   :  { %p1840_p2 = scmp.ne.s32.totalorder %s2495_s3, %s1839_s15  ;;  %p1843_p3 = scmp.lt.u32.totalorder %s1839_s15, %s2495_s3 }
  0x2b   :  { %p1845_p4 = pnand %p1843_p3, %p1840_p2 }
  0x2d   :  { %1848 = shalt.err (!%p1845_p4)
}
  0x2e   :  { %s1849_s0 = scalar_lea.vmem %s54_s26, 256  ;;  %p1854_p6 = scmp.lt.s32.totalorder %s54_s26, %s54_s26 }
  0x2f   :  { %p1850_p5 = scmp.ne.s32.totalorder %s54_s26, %s1849_s0  ;;  %p1855_p7 = scmp.lt.s32.totalorder %s1849_s0, %s1849_s0 }
  0x31   :  { %p1856_p8 = por %p1855_p7, %p1854_p6 }
  0x33   :  { %p1857_p9 = pnand %p1856_p8, %p1850_p5 }
  0x35   :  { %1860 = shalt.err (!%p1857_p9)
}
  0x36   :  { %59 = dma.hbm_to_vmem [thread:$0]  %s2495_s3, 256, %s54_s26, [#allocation9], %s1963_s1, %s1963_s1, %s1964_s18  }
  0x37   :  { %s1861_s24 = scalar_lea.hbm %s2497_s5, 1024 }
  0x38   :  { %p1862_p10 = scmp.ne.s32.totalorder %s2497_s5, %s1861_s24  ;;  %p1865_p11 = scmp.lt.u32.totalorder %s1861_s24, %s2497_s5 }
  0x3a   :  { %p1867_p12 = pnand %p1865_p11, %p1862_p10 }
  0x3c   :  { %1870 = shalt.err (!%p1867_p12)
}
  0x3d   :  { %s1871_s15 = scalar_lea.vmem %s2066_s30, 1024  ;;  %p1876_p0 = scmp.lt.s32.totalorder %s2066_s30, %s2066_s30 }
  0x3e   :  { %p1872_p13 = scmp.ne.s32.totalorder %s2066_s30, %s1871_s15  ;;  %p1877_p1 = scmp.lt.s32.totalorder %s1871_s15, %s1871_s15 }
  0x40   :  { %p1878_p2 = por %p1877_p1, %p1876_p0 }
  0x42   :  { %p1879_p3 = pnand %p1878_p2, %p1872_p13 }
  0x44   :  { %1882 = shalt.err (!%p1879_p3)
}
  0x45   :  { %s1967_s3 = smov 128   ;;  %s1968_s18 = smov 8  }
  0x46   :  { %73 = dma.hbm_to_vmem [thread:$0]  %s2497_s5, 1024, %s2066_s30, [#allocation12], %s1967_s3, %s1967_s3, %s1968_s18  }
  0x47   :  { %1949 = dma.done.wait [#allocation6], 128  }
  0x48   :  { %1950 = vsyncadd [#allocation6], 4294967168 }
  0x49   :  { %1951 = dma.done.wait [#allocation9], 320  }
  0x4a   :  { %1952 = vsyncadd [#allocation9], 4294966976 }
  0x4b   :  { %1953 = dma.done.wait [#allocation12], 1024  }
  0x4c   :  { %1954 = vsyncadd [#allocation12], 4294966272  ;;  %v199_v0 = vlaneseq  ;;  %v1969_v1 = vmov 1966171168   ;;  %v1970_v3 = vmov 0.0   ;;  %vm1971_vm0 = vmmov 0  }
  0x4d   :  { %v197_v2 = vunpack.c.l.s4 %v1969_v1  ;;  %1616 = vmatprep.subr.bf16.mxu0 %v1970_v3  ;;  %1620 = vmatprep.mubr.msk.bf16.mxu0 %vm1971_vm0, %v1970_v3  ;;  %v188_v7 = vld [vmem:[#allocation8 + $0x2] sm:$0x3]  ;;  %v1650_v9 = vld [vmem:[#allocation10] sm:$0xff]   ;;  %v1651_v10 = vld [vmem:[#allocation10 + $0x8] sm:$0xff]   ;;  %v1972_v11 = vmov 0   ;;  %vm192_vm1 = vcmask 253952  }
  0x4e   :  { %v200_v4 = vshrl.u32 %v199_v0, 7  ;;  %v194_v8 = vpack.c.bf16 %v188_v7, %v188_v7  ;;  %292 = vmatprep.mubr.bf16.mxu1 %v1972_v11  ;;  %1617 = vmatpush3.bf16.msra.mxu0 %v1650_v9  ;;  %v2109_v13 = vld [vmem:[#allocation11 + $0x4] ss:$8 sps:$4 sm:$0xff]   ;;  %v2111_v14 = vld [vmem:[#allocation11] ss:$8 sps:$4 sm:$0xff]   ;;  %vm123_vm2 = vcmask 261120  }
  0x4f   :  { %v198_v5 = vunpack.c.0.s8 %v197_v2  ;;  %1618 = vmatprep.subr.bf16.mxu0 %v1970_v3  ;;  %v1655_v15 = vld [vmem:[#allocation5] sm:$0xff]   ;;  %260 = vmatprep.subr.bf16.mxu1 %v2109_v13  ;;  %v2116_v17 = vld [vmem:[#allocation11 + $0x14] ss:$8 sps:$4 sm:$0xff]   ;;  %v2118_v18 = vld [vmem:[#allocation11 + $0x10] ss:$8 sps:$4 sm:$0xff]   ;;  %vm213_vm3 = vcmask 516352  }
  0x50   :  { %261 = vmatpush1.bf16.msra.mxu1 %v2111_v14  ;;  %v185_v19 = vld [vmem:[#allocation8] sm:$0x3]  ;;  %v2127_v22 = vld [vmem:[#allocation11 + $0x20] ss:$8 sps:$4 sm:$0xff]   ;;  %v186_v23 = vld [vmem:[%s2494_s2] sm:$0x3] }
  0x51   :  { %v2105_v6 = vsub.s32 %v198_v5, %v200_v4  ;;  %v191_v20 = vpack.c.bf16 %v185_v19, %v185_v19  ;;  %v2122_v21 = vld [vmem:[#allocation11 + $0x24] ss:$8 sps:$4 sm:$0xff]   ;;  %262 = vmatprep.subr.bf16.mxu1 %v2116_v17  ;;  %v2135_v24 = vld [vmem:[#allocation11 + $0x34] ss:$8 sps:$4 sm:$0xff]   ;;  %310 = vrot.lane.b32.xlu1 %v186_v23, %s1960_s27  ;;  %v2142_v25 = vld [vmem:[#allocation11 + $0x30] ss:$8 sps:$4 sm:$0xff]  }
  0x52   :  { %1619 = vmatpush3.bf16.msra.mxu0 %v1651_v10  ;;  %vm256_vm4 = vcmask 523264   ;;  %v1566_v28 = vld [vmem:[%s2496_s4] ss:$0 sm:$0xff]  ;;  %vm758_vm5 = vcmask 256002   ;;  %vm1042_vm6 = vcmask 258052   ;;  %vm1326_vm7 = vcmask 260102  }
  0x53   :  { %v202_v12 = vrot.slane %v194_v8, %v2105_v6  ;;  %354 = vmatprep.subr.bf16.mxu0 %v2109_v13  ;;  %193 = vst.msk [vmem:[#allocation4] sm:$0x1] %vm192_vm1, %v191_v20  ;;  %v2187_v60 = vld [vmem:[%s2498_s6] ss:$0 sm:$0xff]  ;;  %v1572_v8 = vld [vmem:[%s2494_s2 + $0x2] sm:$0x3] }
  0x54   :  { %263 = vmatpush1.bf16.msra.mxu1 %v2118_v18  ;;  %s1973_s2 = smov 96   ;;  %vm1427_vm8 = vcmask 254976   ;;  %vm616_vm9 = vcmask 254977   ;;  %vm900_vm10 = vcmask 257027   ;;  %vm1184_vm11 = vcmask 259077  }
  0x55   :  { %v209_v16 = vrot.slane %v202_v12, %v2105_v6  ;;  %1621 = vmatmul.mubr.msk.bf16.vlgmr.msra.gmra.mrb[0].mxu0 %vm123_vm2, %v1655_v15  ;;  %264 = vmatprep.subr.bf16.mxu1 %v2122_v21  ;;  %vm1421_vm12 = vcmask 261127  }
  0x56   :  { %355 = vmatpush1.bf16.msra.mxu0 %v2111_v14  ;;  %386 = vmatprep.mubr.bf16.mxu0 %v1972_v11 }
  0x57   :  { %210 = vrot.lane.b32.xlu0 %v209_v16, %s1960_s27  ;;  %356 = vmatprep.subr.bf16.mxu0 %v2116_v17 }
  0x58   :  { %265 = vmatpush1.bf16.msra.mxu1 %v2127_v22 }
  0x59   :  { %266 = vmatprep.subr.bf16.mxu1 %v2135_v24 }
  0x5a   :  { %357 = vmatpush1.bf16.msra.mxu0 %v2118_v18 }
  0x5b   :  { %358 = vmatprep.subr.bf16.mxu0 %v2122_v21 }
  0x5c   :  { %267 = vmatpush1.bf16.msra.mxu1 %v2142_v25 }
  0x5d   :  { %498 = vmatprep.subr.bf16.mxu1 %v2109_v13 }
  0x5e   :  { %359 = vmatpush1.bf16.msra.mxu0 %v2127_v22 }
  0x5f   :  { %360 = vmatprep.subr.bf16.mxu0 %v2135_v24 }
  0x62   :  { %361 = vmatpush1.bf16.msra.mxu0 %v2142_v25 }
  0x63   :  { %640 = vmatprep.subr.bf16.mxu0 %v2109_v13 }
  0xc3   :  { %v311_v48 = vpop.permute.xlu1 %310 }
  0xc9   :  { %v211_v26 = vpop.permute.xlu0 %210 }
  0xca   :  { %214 = vst.msk [vmem:[#allocation4] sm:$0x1] %vm213_vm3, %v211_v26 }
  0xd1   :  { %v215_v27 = vld [vmem:[#allocation4] sm:$0x1] }
  0xd2   :  { %1581 = vmatmul.mubr.msk.bf16.vlgmr.msra.gmra.mrb[0].mxu1 %vm256_vm4, %v215_v27 }
  0xd3   :  { %499 = vmatpush1.bf16.msra.mxu1 %v2111_v14  ;;  %530 = vmatprep.mubr.bf16.mxu1 %v1972_v11 }
  0xd4   :  { %500 = vmatprep.subr.bf16.mxu1 %v2116_v17 }
  0xd7   :  { %501 = vmatpush1.bf16.msra.mxu1 %v2118_v18 }
  0xd8   :  { %502 = vmatprep.subr.bf16.mxu1 %v2122_v21 }
  0xdb   :  { %503 = vmatpush1.bf16.msra.mxu1 %v2127_v22 }
  0xdc   :  { %504 = vmatprep.subr.bf16.mxu1 %v2135_v24 }
  0xdf   :  { %505 = vmatpush1.bf16.msra.mxu1 %v2142_v25 }
  0xe0   :  { %782 = vmatprep.subr.bf16.mxu1 %v2109_v13 }
 0x128   :  { %v161_v29 = vpop.f32.mrb[0].mxu0 }
 0x129   :  { %v162_v30 = vadd.f32 %v1566_v28, %v161_v29  ;;  %v1622_v31 = vpop.f32.mrb[1].mxu0 }
 0x12a   :  { %v164_v32 = vpop.f32.mrb[2].mxu0 }
 0x12b   :  { %168 = vst [vmem:[#allocation2] sm:$0xff] %v162_v30  ;;  %v165_v33 = vadd.f32 %v1566_v28, %v164_v32  ;;  %v1623_v34 = vpop.f32.mrb[3].mxu0 }
 0x12d   :  { %169 = vst [vmem:[#allocation2 + $0x8] sm:$0xff] %v165_v33 }
 0x132   :  { %v300_v35 = vld [vmem:[#allocation2] sm:$0x3]  ;;  %v395_v62 = vld [vmem:[#allocation2 + $0x2] sm:$0x3] }
 0x1a5   :  { %v294_v36 = vpop.f32.mrb[0].mxu1 }
 0x1a6   :  { %v301_v37 = vadd.f32 %v300_v35, %v294_v36  ;;  %v296_v38 = vpop.f32.mrb[1].mxu1 }
 0x1a7   :  { %v297_v39 = vpop.f32.mrb[2].mxu1 }
 0x1a8   :  { %1667 = vtanh.f32 %v301_v37  ;;  %v298_v40 = vpop.f32.mrb[3].mxu1  ;;  %v1582_v42 = vmul.f32 -1.442695, %v301_v37 }
 0x1aa   :  { %1669 = vpow2.f32 %v1582_v42 }
 0x1b2   :  { %v1668_v41 = vpop.eup %1667 }
 0x1b3   :  { %315 = vrot.lane.b32.xlu0 %v1668_v41, %s1960_s27 }
 0x1b4   :  { %v1670_v43 = vpop.eup %1669 }
 0x1b5   :  { %v305_v44 = vadd.f32 1.0, %v1670_v43 }
 0x1b7   :  { %1671 = vrcp.f32 %v305_v44 }
 0x1c1   :  { %v1672_v45 = vpop.eup %1671 }
 0x1c2   :  { %v313_v49 = vmul.f32 %v1672_v45, %v311_v48 }
 0x225   :  { %v316_v46 = vpop.permute.xlu0 %315 }
 0x226   :  { %v318_v47 = vmul.f32 %v1672_v45, %v316_v46 }
 0x228   :  { %320 = vrot.lane.b32.xlu1 %v318_v47, %s1960_s27 }
 0x29a   :  { %v321_v50 = vpop.permute.xlu1 %320 }
 0x29b   :  { %v323_v51 = vadd.f32 %v321_v50, %v313_v49 }
 0x29d   :  { %1673 = vtanh.f32 %v323_v51 }
 0x2a7   :  { %v1674_v52 = vpop.eup %1673 }
 0x2a8   :  { %326 = vrot.lane.b32.xlu0 %v1674_v52, %s1960_s27 }
 0x31a   :  { %v327_v53 = vpop.permute.xlu0 %326 }
 0x31b   :  { %v329_v54 = vmul.f32 %v1672_v45, %v327_v53  ;;  %v539_v53 = vld [vmem:[#allocation2 + $0x4] sm:$0x3] }
 0x31d   :  { %v330_v55 = vpack.c.bf16 %v329_v54, %v329_v54 }
 0x31f   :  { %v338_v56 = vrot.slane %v330_v55, %v2105_v6 }
 0x321   :  { %v345_v57 = vrot.slane %v338_v56, %v2105_v6 }
 0x323   :  { %346 = vrot.lane.b32.xlu1 %v345_v57, %s1963_s1 }
 0x395   :  { %v347_v58 = vpop.permute.xlu1 %346 }
 0x396   :  { %349 = vst.msk [vmem:[#allocation4] sm:$0x1] %vm192_vm1, %v347_v58 }
 0x39d   :  { %v350_v59 = vld [vmem:[#allocation4] sm:$0x1] }
 0x39e   :  { %1583 = vmatmul.mubr.msk.bf16.vlgmr.msra.gmra.mrb[4].mxu0 %vm256_vm4, %v350_v59 }
 0x39f   :  { %641 = vmatpush1.bf16.msra.mxu0 %v2111_v14  ;;  %672 = vmatprep.mubr.bf16.mxu0 %v1972_v11 }
 0x3a0   :  { %642 = vmatprep.subr.bf16.mxu0 %v2116_v17 }
 0x3a3   :  { %643 = vmatpush1.bf16.msra.mxu0 %v2118_v18 }
 0x3a4   :  { %644 = vmatprep.subr.bf16.mxu0 %v2122_v21 }
 0x3a7   :  { %645 = vmatpush1.bf16.msra.mxu0 %v2127_v22 }
 0x3a8   :  { %646 = vmatprep.subr.bf16.mxu0 %v2135_v24 }
 0x3ab   :  { %647 = vmatpush1.bf16.msra.mxu0 %v2142_v25 }
 0x3ac   :  { %924 = vmatprep.subr.bf16.mxu0 %v2109_v13 }
 0x471   :  { %v388_v61 = vpop.f32.mrb[4].mxu0 }
 0x472   :  { %v396_v63 = vadd.f32 %v395_v62, %v388_v61  ;;  %v390_v0 = vpop.f32.mrb[5].mxu0 }
 0x473   :  { %v441_v1 = vadd.f32 %v2187_v60, %v390_v0  ;;  %v392_v2 = vpop.f32.mrb[6].mxu0 }
 0x474   :  { %1675 = vtanh.f32 %v396_v63  ;;  %v393_v4 = vpop.f32.mrb[7].mxu0  ;;  %v1584_v9 = vmul.f32 -1.442695, %v396_v63 }
 0x475   :  { %1677 = vtanh.f32 %v441_v1  ;;  %v1585_v10 = vmul.f32 -1.442695, %v441_v1 }
 0x476   :  { %1679 = vpow2.f32 %v1584_v9 }
 0x477   :  { %1681 = vpow2.f32 %v1585_v10 }
 0x47e   :  { %v1676_v5 = vpop.eup %1675 }
 0x47f   :  { %v1678_v7 = vpop.eup %1677  ;;  %406 = vrot.lane.b32.xlu0 %v1676_v5, %s1960_s27 }
 0x480   :  { %455 = vrot.lane.b32.xlu1 %v1678_v7, %s1960_s27  ;;  %v1680_v12 = vpop.eup %1679 }
 0x481   :  { %v1682_v15 = vpop.eup %1681  ;;  %v400_v16 = vadd.f32 1.0, %v1680_v12 }
 0x482   :  { %v445_v19 = vadd.f32 1.0, %v1682_v15 }
 0x483   :  { %450 = vrot.lane.b32.xlu0 %v1572_v8, %s1960_s27  ;;  %1683 = vrcp.f32 %v400_v16 }
 0x484   :  { %1685 = vrcp.f32 %v445_v19 }
 0x48d   :  { %v1684_v20 = vpop.eup %1683 }
 0x48e   :  { %v1686_v26 = vpop.eup %1685  ;;  %v404_v31 = vmul.f32 %v1684_v20, %v323_v51 }
 0x4f1   :  { %v407_v23 = vpop.permute.xlu0 %406 }
 0x4f2   :  { %v409_v27 = vmul.f32 %v1684_v20, %v407_v23  ;;  %v456_v28 = vpop.permute.xlu1 %455 }
 0x4f3   :  { %v458_v29 = vmul.f32 %v1686_v26, %v456_v28 }
 0x4f4   :  { %411 = vrot.lane.b32.xlu1 %v409_v27, %s1960_s27 }
 0x4f5   :  { %460 = vrot.lane.b32.xlu0 %v458_v29, %s1960_s27  ;;  %v451_v30 = vpop.permute.xlu0 %450 }
 0x4f6   :  { %v453_v32 = vmul.f32 %v1686_v26, %v451_v30 }
 0x566   :  { %v412_v33 = vpop.permute.xlu1 %411 }
 0x567   :  { %v2198_v34 = vadd.f32 %v412_v33, %v404_v31  ;;  %v461_v35 = vpop.permute.xlu0 %460 }
 0x568   :  { %v2200_v36 = vadd.f32 %v461_v35, %v453_v32 }
 0x569   :  { %1687 = vtanh.f32 %v2198_v34 }
 0x56a   :  { %1689 = vtanh.f32 %v2200_v36 }
 0x573   :  { %v1688_v37 = vpop.eup %1687 }
 0x574   :  { %v1690_v38 = vpop.eup %1689  ;;  %417 = vrot.lane.b32.xlu1 %v1688_v37, %s1960_s27 }
 0x575   :  { %466 = vrot.lane.b32.xlu0 %v1690_v38, %s1960_s27 }
 0x5e6   :  { %v418_v39 = vpop.permute.xlu1 %417 }
 0x5e7   :  { %v420_v40 = vmul.f32 %v1684_v20, %v418_v39  ;;  %v467_v41 = vpop.permute.xlu0 %466 }
 0x5e8   :  { %v469_v42 = vmul.f32 %v1686_v26, %v467_v41 }
 0x5e9   :  { %v421_v43 = vpack.c.bf16 %v420_v40, %v420_v40 }
 0x5ea   :  { %v2206_v44 = vpack.c.bf16 %v469_v42, %v469_v42 }
 0x5eb   :  { %v429_v45 = vrot.slane %v421_v43, %v2105_v6  ;;  %v681_v43 = vld [vmem:[#allocation2 + $0x6] sm:$0x3] }
 0x5ec   :  { %v482_v46 = vrot.slane %v2206_v44, %v2105_v6 }
 0x5ed   :  { %v436_v47 = vrot.slane %v429_v45, %v2105_v6 }
 0x5ee   :  { %v489_v48 = vrot.slane %v482_v46, %v2105_v6 }
 0x5ef   :  { %437 = vrot.lane.b32.xlu1 %v436_v47, %s1963_s1 }
 0x5f0   :  { %490 = vrot.lane.b32.xlu0 %v489_v48, %s1973_s2 }
 0x661   :  { %v438_v49 = vpop.permute.xlu1 %437 }
 0x662   :  { %440 = vst.msk [vmem:[#allocation4] sm:$0x1] %vm192_vm1, %v438_v49  ;;  %v491_v50 = vpop.permute.xlu0 %490 }
 0x663   :  { %493 = vst.msk [vmem:[#allocation4] sm:$0x1] %vm213_vm3, %v491_v50 }
 0x66a   :  { %v494_v51 = vld [vmem:[#allocation4] sm:$0x1] }
 0x66b   :  { %1586 = vmatmul.mubr.msk.bf16.vlgmr.msra.gmra.mrb[4].mxu1 %vm256_vm4, %v494_v51 }
 0x66c   :  { %783 = vmatpush1.bf16.msra.mxu1 %v2111_v14  ;;  %814 = vmatprep.mubr.bf16.mxu1 %v1972_v11 }
 0x66d   :  { %784 = vmatprep.subr.bf16.mxu1 %v2116_v17 }
 0x670   :  { %785 = vmatpush1.bf16.msra.mxu1 %v2118_v18 }
 0x671   :  { %786 = vmatprep.subr.bf16.mxu1 %v2122_v21 }
 0x674   :  { %787 = vmatpush1.bf16.msra.mxu1 %v2127_v22 }
 0x675   :  { %788 = vmatprep.subr.bf16.mxu1 %v2135_v24 }
 0x678   :  { %789 = vmatpush1.bf16.msra.mxu1 %v2142_v25 }
 0x679   :  { %1066 = vmatprep.subr.bf16.mxu1 %v2109_v13 }
 0x73e   :  { %v532_v52 = vpop.f32.mrb[4].mxu1 }
 0x73f   :  { %v540_v54 = vadd.f32 %v539_v53, %v532_v52  ;;  %v534_v55 = vpop.f32.mrb[5].mxu1 }
 0x740   :  { %v585_v56 = vadd.f32 %v2187_v60, %v534_v55  ;;  %v536_v57 = vpop.f32.mrb[6].mxu1 }
 0x741   :  { %1691 = vtanh.f32 %v540_v54  ;;  %v537_v58 = vpop.f32.mrb[7].mxu1  ;;  %v1587_v62 = vmul.f32 -1.442695, %v540_v54 }
 0x742   :  { %1693 = vtanh.f32 %v585_v56  ;;  %v1588_v63 = vmul.f32 -1.442695, %v585_v56 }
 0x743   :  { %1695 = vpow2.f32 %v1587_v62 }
 0x744   :  { %1697 = vpow2.f32 %v1588_v63 }
 0x74b   :  { %v1692_v59 = vpop.eup %1691 }
 0x74c   :  { %v1694_v61 = vpop.eup %1693  ;;  %550 = vrot.lane.b32.xlu1 %v1692_v59, %s1960_s27 }
 0x74d   :  { %595 = vrot.lane.b32.xlu0 %v1694_v61, %s1960_s27  ;;  %v1696_v0 = vpop.eup %1695 }
 0x74e   :  { %v1698_v1 = vpop.eup %1697  ;;  %v544_v2 = vadd.f32 1.0, %v1696_v0 }
 0x74f   :  { %v589_v4 = vadd.f32 1.0, %v1698_v1 }
 0x750   :  { %1699 = vrcp.f32 %v544_v2 }
 0x751   :  { %1701 = vrcp.f32 %v589_v4 }
 0x75a   :  { %v1700_v5 = vpop.eup %1699 }
 0x75b   :  { %v1702_v8 = vpop.eup %1701  ;;  %v548_v15 = vmul.f32 %v1700_v5, %v2198_v34 }
 0x75c   :  { %v593_v19 = vmul.f32 %v1702_v8, %v2200_v36 }
 0x7be   :  { %v551_v7 = vpop.permute.xlu1 %550 }
 0x7bf   :  { %v553_v9 = vmul.f32 %v1700_v5, %v551_v7  ;;  %v596_v10 = vpop.permute.xlu0 %595 }
 0x7c0   :  { %v598_v12 = vmul.f32 %v1702_v8, %v596_v10 }
 0x7c1   :  { %555 = vrot.lane.b32.xlu1 %v553_v9, %s1960_s27 }
 0x7c2   :  { %600 = vrot.lane.b32.xlu0 %v598_v12, %s1960_s27 }
 0x833   :  { %v556_v16 = vpop.permute.xlu1 %555 }
 0x834   :  { %v2234_v20 = vadd.f32 %v556_v16, %v548_v15  ;;  %v601_v23 = vpop.permute.xlu0 %600 }
 0x835   :  { %v2236_v26 = vadd.f32 %v601_v23, %v593_v19 }
 0x836   :  { %1703 = vtanh.f32 %v2234_v20 }
 0x837   :  { %1705 = vtanh.f32 %v2236_v26 }
 0x840   :  { %v1704_v27 = vpop.eup %1703 }
 0x841   :  { %v1706_v28 = vpop.eup %1705  ;;  %561 = vrot.lane.b32.xlu1 %v1704_v27, %s1960_s27 }
 0x842   :  { %606 = vrot.lane.b32.xlu0 %v1706_v28, %s1960_s27 }
 0x8b3   :  { %v562_v29 = vpop.permute.xlu1 %561 }
 0x8b4   :  { %v564_v30 = vmul.f32 %v1700_v5, %v562_v29  ;;  %v607_v31 = vpop.permute.xlu0 %606 }
 0x8b5   :  { %v609_v32 = vmul.f32 %v1702_v8, %v607_v31 }
 0x8b6   :  { %v565_v33 = vpack.c.bf16 %v564_v30, %v564_v30 }
 0x8b7   :  { %v2242_v34 = vpack.c.bf16 %v609_v32, %v609_v32 }
 0x8b8   :  { %v573_v35 = vrot.slane %v565_v33, %v2105_v6 }
 0x8b9   :  { %v624_v36 = vrot.slane %v2242_v34, %v2105_v6 }
 0x8ba   :  { %v580_v37 = vrot.slane %v573_v35, %v2105_v6  ;;  %v823_v35 = vld [vmem:[#allocation2 + $0x8] sm:$0x3] }
 0x8bb   :  { %v631_v38 = vrot.slane %v624_v36, %v2105_v6 }
 0x8bc   :  { %581 = vrot.lane.b32.xlu1 %v580_v37, %s1963_s1 }
 0x8bd   :  { %632 = vrot.lane.b32.xlu0 %v631_v38, %s1973_s2 }
 0x92e   :  { %v582_v39 = vpop.permute.xlu1 %581 }
 0x92f   :  { %584 = vst.msk [vmem:[#allocation4] sm:$0x1] %vm192_vm1, %v582_v39  ;;  %v633_v40 = vpop.permute.xlu0 %632 }
 0x930   :  { %635 = vst.msk [vmem:[#allocation4] sm:$0x1] %vm213_vm3, %v633_v40 }
 0x937   :  { %v636_v41 = vld [vmem:[#allocation4] sm:$0x1] }
 0x938   :  { %1589 = vmatmul.mubr.msk.bf16.vlgmr.msra.gmra.mrb[8].mxu0 %vm256_vm4, %v636_v41 }
 0x939   :  { %925 = vmatpush1.bf16.msra.mxu0 %v2111_v14  ;;  %956 = vmatprep.mubr.bf16.mxu0 %v1972_v11 }
 0x93a   :  { %926 = vmatprep.subr.bf16.mxu0 %v2116_v17 }
 0x93d   :  { %927 = vmatpush1.bf16.msra.mxu0 %v2118_v18 }
 0x93e   :  { %928 = vmatprep.subr.bf16.mxu0 %v2122_v21 }
 0x941   :  { %929 = vmatpush1.bf16.msra.mxu0 %v2127_v22 }
 0x942   :  { %930 = vmatprep.subr.bf16.mxu0 %v2135_v24 }
 0x945   :  { %931 = vmatpush1.bf16.msra.mxu0 %v2142_v25 }
 0x946   :  { %1208 = vmatprep.subr.bf16.mxu0 %v2109_v13 }
 0xa0b   :  { %v674_v42 = vpop.f32.mrb[8].mxu0 }
 0xa0c   :  { %v682_v45 = vadd.f32 %v681_v43, %v674_v42  ;;  %v676_v46 = vpop.f32.mrb[9].mxu0 }
 0xa0d   :  { %v727_v47 = vadd.f32 %v2187_v60, %v676_v46  ;;  %v678_v48 = vpop.f32.mrb[10].mxu0 }
 0xa0e   :  { %1707 = vtanh.f32 %v682_v45  ;;  %v679_v49 = vpop.f32.mrb[11].mxu0  ;;  %v1590_v52 = vmul.f32 -1.442695, %v682_v45 }
 0xa0f   :  { %1709 = vtanh.f32 %v727_v47  ;;  %v1591_v53 = vmul.f32 -1.442695, %v727_v47 }
 0xa10   :  { %1711 = vpow2.f32 %v1590_v52 }
 0xa11   :  { %1713 = vpow2.f32 %v1591_v53 }
 0xa18   :  { %v1708_v50 = vpop.eup %1707 }
 0xa19   :  { %v1710_v51 = vpop.eup %1709  ;;  %692 = vrot.lane.b32.xlu1 %v1708_v50, %s1960_s27 }
 0xa1a   :  { %737 = vrot.lane.b32.xlu0 %v1710_v51, %s1960_s27  ;;  %v1712_v54 = vpop.eup %1711 }
 0xa1b   :  { %v1714_v55 = vpop.eup %1713  ;;  %v686_v56 = vadd.f32 1.0, %v1712_v54 }
 0xa1c   :  { %v731_v57 = vadd.f32 1.0, %v1714_v55 }
 0xa1d   :  { %1715 = vrcp.f32 %v686_v56 }
 0xa1e   :  { %1717 = vrcp.f32 %v731_v57 }
 0xa27   :  { %v1716_v58 = vpop.eup %1715 }
 0xa28   :  { %v1718_v61 = vpop.eup %1717  ;;  %v690_v1 = vmul.f32 %v1716_v58, %v2234_v20 }
 0xa29   :  { %v735_v4 = vmul.f32 %v1718_v61, %v2236_v26 }
 0xa8b   :  { %v693_v59 = vpop.permute.xlu1 %692 }
 0xa8c   :  { %v695_v62 = vmul.f32 %v1716_v58, %v693_v59  ;;  %v738_v63 = vpop.permute.xlu0 %737 }
 0xa8d   :  { %v740_v0 = vmul.f32 %v1718_v61, %v738_v63 }
 0xa8e   :  { %697 = vrot.lane.b32.xlu1 %v695_v62, %s1960_s27 }
 0xa8f   :  { %742 = vrot.lane.b32.xlu0 %v740_v0, %s1960_s27 }
 0xb00   :  { %v698_v2 = vpop.permute.xlu1 %697 }
 0xb01   :  { %v2270_v5 = vadd.f32 %v698_v2, %v690_v1  ;;  %v743_v7 = vpop.permute.xlu0 %742 }
 0xb02   :  { %v2272_v8 = vadd.f32 %v743_v7, %v735_v4 }
 0xb03   :  { %1719 = vtanh.f32 %v2270_v5 }
 0xb04   :  { %1721 = vtanh.f32 %v2272_v8 }
 0xb0d   :  { %v1720_v9 = vpop.eup %1719 }
 0xb0e   :  { %v1722_v10 = vpop.eup %1721  ;;  %703 = vrot.lane.b32.xlu1 %v1720_v9, %s1960_s27 }
 0xb0f   :  { %748 = vrot.lane.b32.xlu0 %v1722_v10, %s1960_s27 }
 0xb80   :  { %v704_v12 = vpop.permute.xlu1 %703 }
 0xb81   :  { %v706_v15 = vmul.f32 %v1716_v58, %v704_v12  ;;  %v749_v16 = vpop.permute.xlu0 %748 }
 0xb82   :  { %v751_v19 = vmul.f32 %v1718_v61, %v749_v16 }
 0xb83   :  { %v707_v20 = vpack.c.bf16 %v706_v15, %v706_v15 }
 0xb84   :  { %v2278_v23 = vpack.c.bf16 %v751_v19, %v751_v19 }
 0xb85   :  { %v715_v26 = vrot.slane %v707_v20, %v2105_v6 }
 0xb86   :  { %v766_v27 = vrot.slane %v2278_v23, %v2105_v6 }
 0xb87   :  { %v722_v28 = vrot.slane %v715_v26, %v2105_v6  ;;  %v965_v26 = vld [vmem:[#allocation2 + $0xa] sm:$0x3] }
 0xb88   :  { %v773_v29 = vrot.slane %v766_v27, %v2105_v6 }
 0xb89   :  { %723 = vrot.lane.b32.xlu1 %v722_v28, %s1963_s1 }
 0xb8a   :  { %774 = vrot.lane.b32.xlu0 %v773_v29, %s1973_s2 }
 0xbfb   :  { %v724_v30 = vpop.permute.xlu1 %723 }
 0xbfc   :  { %726 = vst.msk [vmem:[#allocation4] sm:$0x1] %vm192_vm1, %v724_v30  ;;  %v775_v31 = vpop.permute.xlu0 %774 }
 0xbfd   :  { %777 = vst.msk [vmem:[#allocation4] sm:$0x1] %vm213_vm3, %v775_v31 }
 0xc04   :  { %v778_v32 = vld [vmem:[#allocation4] sm:$0x1] }
 0xc05   :  { %1592 = vmatmul.mubr.msk.bf16.vlgmr.msra.gmra.mrb[8].mxu1 %vm256_vm4, %v778_v32 }
 0xc06   :  { %1067 = vmatpush1.bf16.msra.mxu1 %v2111_v14  ;;  %1098 = vmatprep.mubr.bf16.mxu1 %v1972_v11 }
 0xc07   :  { %1068 = vmatprep.subr.bf16.mxu1 %v2116_v17 }
 0xc0a   :  { %1069 = vmatpush1.bf16.msra.mxu1 %v2118_v18 }
 0xc0b   :  { %1070 = vmatprep.subr.bf16.mxu1 %v2122_v21 }
 0xc0e   :  { %1071 = vmatpush1.bf16.msra.mxu1 %v2127_v22 }
 0xc0f   :  { %1072 = vmatprep.subr.bf16.mxu1 %v2135_v24 }
 0xc12   :  { %1073 = vmatpush1.bf16.msra.mxu1 %v2142_v25 }
 0xc13   :  { %1350 = vmatprep.subr.bf16.mxu1 %v2109_v13 }
 0xcd8   :  { %v816_v33 = vpop.f32.mrb[8].mxu1 }
 0xcd9   :  { %v824_v36 = vadd.f32 %v823_v35, %v816_v33  ;;  %v818_v37 = vpop.f32.mrb[9].mxu1 }
 0xcda   :  { %v869_v38 = vadd.f32 %v2187_v60, %v818_v37  ;;  %v820_v39 = vpop.f32.mrb[10].mxu1 }
 0xcdb   :  { %1723 = vtanh.f32 %v824_v36  ;;  %v821_v40 = vpop.f32.mrb[11].mxu1  ;;  %v1593_v43 = vmul.f32 -1.442695, %v824_v36 }
 0xcdc   :  { %1725 = vtanh.f32 %v869_v38  ;;  %v1594_v45 = vmul.f32 -1.442695, %v869_v38 }
 0xcdd   :  { %1727 = vpow2.f32 %v1593_v43 }
 0xcde   :  { %1729 = vpow2.f32 %v1594_v45 }
 0xce5   :  { %v1724_v41 = vpop.eup %1723 }
 0xce6   :  { %v1726_v42 = vpop.eup %1725  ;;  %834 = vrot.lane.b32.xlu1 %v1724_v41, %s1960_s27 }
 0xce7   :  { %879 = vrot.lane.b32.xlu0 %v1726_v42, %s1960_s27  ;;  %v1728_v13 = vpop.eup %1727 }
 0xce8   :  { %v1730_v46 = vpop.eup %1729  ;;  %v828_v47 = vadd.f32 1.0, %v1728_v13 }
 0xce9   :  { %v873_v48 = vadd.f32 1.0, %v1730_v46 }
 0xcea   :  { %1731 = vrcp.f32 %v828_v47 }
 0xceb   :  { %1733 = vrcp.f32 %v873_v48 }
 0xcf4   :  { %v1732_v49 = vpop.eup %1731 }
 0xcf5   :  { %v1734_v51 = vpop.eup %1733  ;;  %v832_v55 = vmul.f32 %v1732_v49, %v2270_v5 }
 0xcf6   :  { %v877_v57 = vmul.f32 %v1734_v51, %v2272_v8 }
 0xd58   :  { %v835_v50 = vpop.permute.xlu1 %834 }
 0xd59   :  { %v837_v52 = vmul.f32 %v1732_v49, %v835_v50  ;;  %v880_v53 = vpop.permute.xlu0 %879 }
 0xd5a   :  { %v882_v54 = vmul.f32 %v1734_v51, %v880_v53 }
 0xd5b   :  { %839 = vrot.lane.b32.xlu1 %v837_v52, %s1960_s27 }
 0xd5c   :  { %884 = vrot.lane.b32.xlu0 %v882_v54, %s1960_s27 }
 0xdcd   :  { %v840_v56 = vpop.permute.xlu1 %839 }
 0xdce   :  { %v2306_v58 = vadd.f32 %v840_v56, %v832_v55  ;;  %v885_v59 = vpop.permute.xlu0 %884 }
 0xdcf   :  { %v2308_v61 = vadd.f32 %v885_v59, %v877_v57 }
 0xdd0   :  { %1735 = vtanh.f32 %v2306_v58 }
 0xdd1   :  { %1737 = vtanh.f32 %v2308_v61 }
 0xdda   :  { %v1736_v62 = vpop.eup %1735 }
 0xddb   :  { %v1738_v63 = vpop.eup %1737  ;;  %845 = vrot.lane.b32.xlu1 %v1736_v62, %s1960_s27 }
 0xddc   :  { %890 = vrot.lane.b32.xlu0 %v1738_v63, %s1960_s27 }
 0xe4d   :  { %v846_v0 = vpop.permute.xlu1 %845 }
 0xe4e   :  { %v848_v1 = vmul.f32 %v1732_v49, %v846_v0  ;;  %v891_v2 = vpop.permute.xlu0 %890 }
 0xe4f   :  { %v893_v4 = vmul.f32 %v1734_v51, %v891_v2 }
 0xe50   :  { %v849_v5 = vpack.c.bf16 %v848_v1, %v848_v1 }
 0xe51   :  { %v2314_v7 = vpack.c.bf16 %v893_v4, %v893_v4 }
 0xe52   :  { %v857_v8 = vrot.slane %v849_v5, %v2105_v6 }
 0xe53   :  { %v908_v9 = vrot.slane %v2314_v7, %v2105_v6 }
 0xe54   :  { %v864_v10 = vrot.slane %v857_v8, %v2105_v6 }
 0xe55   :  { %v915_v12 = vrot.slane %v908_v9, %v2105_v6  ;;  %v1107_v9 = vld [vmem:[#allocation2 + $0xc] sm:$0x3] }
 0xe56   :  { %865 = vrot.lane.b32.xlu1 %v864_v10, %s1963_s1 }
 0xe57   :  { %916 = vrot.lane.b32.xlu0 %v915_v12, %s1973_s2 }
 0xec8   :  { %v866_v15 = vpop.permute.xlu1 %865 }
 0xec9   :  { %868 = vst.msk [vmem:[#allocation4] sm:$0x1] %vm192_vm1, %v866_v15  ;;  %v917_v16 = vpop.permute.xlu0 %916 }
 0xeca   :  { %919 = vst.msk [vmem:[#allocation4] sm:$0x1] %vm213_vm3, %v917_v16 }
 0xed1   :  { %v920_v19 = vld [vmem:[#allocation4] sm:$0x1] }
 0xed2   :  { %1595 = vmatmul.mubr.msk.bf16.vlgmr.msra.gmra.mrb[12].mxu0 %vm256_vm4, %v920_v19 }
 0xed3   :  { %1209 = vmatpush1.bf16.msra.mxu0 %v2111_v14  ;;  %1240 = vmatprep.mubr.bf16.mxu0 %v1972_v11 }
 0xed4   :  { %1210 = vmatprep.subr.bf16.mxu0 %v2116_v17 }
 0xed7   :  { %1211 = vmatpush1.bf16.msra.mxu0 %v2118_v18 }
 0xed8   :  { %1212 = vmatprep.subr.bf16.mxu0 %v2122_v21 }
 0xedb   :  { %1213 = vmatpush1.bf16.msra.mxu0 %v2127_v22 }
 0xedc   :  { %1214 = vmatprep.subr.bf16.mxu0 %v2135_v24 }
 0xedf   :  { %1215 = vmatpush1.bf16.msra.mxu0 %v2142_v25 }
 0xee0   :  { %1624 = vmatprep.subr.bf16.mxu0 %v1970_v3 }
 0xfa5   :  { %v958_v20 = vpop.f32.mrb[12].mxu0 }
 0xfa6   :  { %v966_v27 = vadd.f32 %v965_v26, %v958_v20  ;;  %v960_v28 = vpop.f32.mrb[13].mxu0 }
 0xfa7   :  { %v1011_v29 = vadd.f32 %v2187_v60, %v960_v28  ;;  %v962_v30 = vpop.f32.mrb[14].mxu0 }
 0xfa8   :  { %1739 = vtanh.f32 %v966_v27  ;;  %v963_v31 = vpop.f32.mrb[15].mxu0  ;;  %v1596_v35 = vmul.f32 -1.442695, %v966_v27 }
 0xfa9   :  { %1741 = vtanh.f32 %v1011_v29  ;;  %v1597_v36 = vmul.f32 -1.442695, %v1011_v29 }
 0xfaa   :  { %1743 = vpow2.f32 %v1596_v35 }
 0xfab   :  { %1745 = vpow2.f32 %v1597_v36 }
 0xfb2   :  { %v1740_v32 = vpop.eup %1739 }
 0xfb3   :  { %v1742_v33 = vpop.eup %1741  ;;  %976 = vrot.lane.b32.xlu1 %v1740_v32, %s1960_s27 }
 0xfb4   :  { %1021 = vrot.lane.b32.xlu0 %v1742_v33, %s1960_s27  ;;  %v1744_v37 = vpop.eup %1743 }
 0xfb5   :  { %v1746_v38 = vpop.eup %1745  ;;  %v970_v39 = vadd.f32 1.0, %v1744_v37 }
 0xfb6   :  { %v1015_v40 = vadd.f32 1.0, %v1746_v38 }
 0xfb7   :  { %1747 = vrcp.f32 %v970_v39 }
 0xfb8   :  { %1749 = vrcp.f32 %v1015_v40 }
 0xfc1   :  { %v1748_v41 = vpop.eup %1747 }
 0xfc2   :  { %v1750_v43 = vpop.eup %1749  ;;  %v974_v47 = vmul.f32 %v1748_v41, %v2306_v58 }
 0xfc3   :  { %v1019_v49 = vmul.f32 %v1750_v43, %v2308_v61 }
0x1025   :  { %v977_v42 = vpop.permute.xlu1 %976 }
0x1026   :  { %v979_v45 = vmul.f32 %v1748_v41, %v977_v42  ;;  %v1022_v13 = vpop.permute.xlu0 %1021 }
0x1027   :  { %v1024_v46 = vmul.f32 %v1750_v43, %v1022_v13 }
0x1028   :  { %981 = vrot.lane.b32.xlu1 %v979_v45, %s1960_s27 }
0x1029   :  { %1026 = vrot.lane.b32.xlu0 %v1024_v46, %s1960_s27 }
0x109a   :  { %v982_v48 = vpop.permute.xlu1 %981 }
0x109b   :  { %v2342_v50 = vadd.f32 %v982_v48, %v974_v47  ;;  %v1027_v51 = vpop.permute.xlu0 %1026 }
0x109c   :  { %v2344_v52 = vadd.f32 %v1027_v51, %v1019_v49 }
0x109d   :  { %1751 = vtanh.f32 %v2342_v50 }
0x109e   :  { %1753 = vtanh.f32 %v2344_v52 }
0x10a7   :  { %v1752_v53 = vpop.eup %1751 }
0x10a8   :  { %v1754_v54 = vpop.eup %1753  ;;  %987 = vrot.lane.b32.xlu1 %v1752_v53, %s1960_s27 }
0x10a9   :  { %1032 = vrot.lane.b32.xlu0 %v1754_v54, %s1960_s27  ;;  %v1249_v54 = vld [vmem:[#allocation2 + $0xe] sm:$0x3] }
0x111a   :  { %v988_v55 = vpop.permute.xlu1 %987 }
0x111b   :  { %v990_v56 = vmul.f32 %v1748_v41, %v988_v55  ;;  %v1033_v57 = vpop.permute.xlu0 %1032 }
0x111c   :  { %v1035_v58 = vmul.f32 %v1750_v43, %v1033_v57 }
0x111d   :  { %v991_v59 = vpack.c.bf16 %v990_v56, %v990_v56 }
0x111e   :  { %v2350_v61 = vpack.c.bf16 %v1035_v58, %v1035_v58 }
0x111f   :  { %v999_v62 = vrot.slane %v991_v59, %v2105_v6 }
0x1120   :  { %v1050_v63 = vrot.slane %v2350_v61, %v2105_v6 }
0x1121   :  { %v1006_v0 = vrot.slane %v999_v62, %v2105_v6 }
0x1122   :  { %v1057_v1 = vrot.slane %v1050_v63, %v2105_v6 }
0x1123   :  { %1007 = vrot.lane.b32.xlu1 %v1006_v0, %s1963_s1 }
0x1124   :  { %1058 = vrot.lane.b32.xlu0 %v1057_v1, %s1973_s2 }
0x1195   :  { %v1008_v2 = vpop.permute.xlu1 %1007 }
0x1196   :  { %1010 = vst.msk [vmem:[#allocation4] sm:$0x1] %vm192_vm1, %v1008_v2  ;;  %v1059_v4 = vpop.permute.xlu0 %1058 }
0x1197   :  { %1061 = vst.msk [vmem:[#allocation4] sm:$0x1] %vm213_vm3, %v1059_v4 }
0x119e   :  { %v1062_v5 = vld [vmem:[#allocation4] sm:$0x1] }
0x119f   :  { %1598 = vmatmul.mubr.msk.bf16.vlgmr.msra.gmra.mrb[12].mxu1 %vm256_vm4, %v1062_v5 }
0x11a0   :  { %1351 = vmatpush1.bf16.msra.mxu1 %v2111_v14  ;;  %1382 = vmatprep.mubr.bf16.mxu1 %v1972_v11 }
0x11a1   :  { %1352 = vmatprep.subr.bf16.mxu1 %v2116_v17 }
0x11a4   :  { %1353 = vmatpush1.bf16.msra.mxu1 %v2118_v18 }
0x11a5   :  { %1354 = vmatprep.subr.bf16.mxu1 %v2122_v21 }
0x11a8   :  { %1355 = vmatpush1.bf16.msra.mxu1 %v2127_v22 }
0x11a9   :  { %1356 = vmatprep.subr.bf16.mxu1 %v2135_v24 }
0x11ac   :  { %1357 = vmatpush1.bf16.msra.mxu1 %v2142_v25 }
0x1272   :  { %v1100_v8 = vpop.f32.mrb[12].mxu1 }
0x1273   :  { %v1108_v10 = vadd.f32 %v1107_v9, %v1100_v8  ;;  %v1102_v12 = vpop.f32.mrb[13].mxu1 }
0x1274   :  { %v1153_v14 = vadd.f32 %v2187_v60, %v1102_v12  ;;  %v1104_v15 = vpop.f32.mrb[14].mxu1 }
0x1275   :  { %1755 = vtanh.f32 %v1108_v10  ;;  %v1105_v11 = vpop.f32.mrb[15].mxu1  ;;  %v1599_v21 = vmul.f32 -1.442695, %v1108_v10 }
0x1276   :  { %1757 = vtanh.f32 %v1153_v14  ;;  %v1600_v22 = vmul.f32 -1.442695, %v1153_v14 }
0x1277   :  { %1759 = vpow2.f32 %v1599_v21 }
0x1278   :  { %1761 = vpow2.f32 %v1600_v22 }
0x127f   :  { %v1756_v17 = vpop.eup %1755 }
0x1280   :  { %v1758_v18 = vpop.eup %1757  ;;  %1118 = vrot.lane.b32.xlu1 %v1756_v17, %s1960_s27 }
0x1281   :  { %1163 = vrot.lane.b32.xlu0 %v1758_v18, %s1960_s27  ;;  %v1760_v24 = vpop.eup %1759 }
0x1282   :  { %v1762_v25 = vpop.eup %1761  ;;  %v1112_v16 = vadd.f32 1.0, %v1760_v24 }
0x1283   :  { %v1157_v19 = vadd.f32 1.0, %v1762_v25 }
0x1284   :  { %1763 = vrcp.f32 %v1112_v16 }
0x1285   :  { %1765 = vrcp.f32 %v1157_v19 }
0x128e   :  { %v1764_v20 = vpop.eup %1763 }
0x128f   :  { %v1766_v27 = vpop.eup %1765  ;;  %v1116_v31 = vmul.f32 %v1764_v20, %v2342_v50 }
0x1290   :  { %v1161_v33 = vmul.f32 %v1766_v27, %v2344_v52 }
0x12f2   :  { %v1119_v26 = vpop.permute.xlu1 %1118 }
0x12f3   :  { %v1121_v28 = vmul.f32 %v1764_v20, %v1119_v26  ;;  %v1164_v29 = vpop.permute.xlu0 %1163 }
0x12f4   :  { %v1166_v30 = vmul.f32 %v1766_v27, %v1164_v29 }
0x12f5   :  { %1123 = vrot.lane.b32.xlu1 %v1121_v28, %s1960_s27 }
0x12f6   :  { %1168 = vrot.lane.b32.xlu0 %v1166_v30, %s1960_s27 }
0x1367   :  { %v1124_v32 = vpop.permute.xlu1 %1123 }
0x1368   :  { %v1126_v35 = vadd.f32 %v1124_v32, %v1116_v31  ;;  %v1169_v36 = vpop.permute.xlu0 %1168 }
0x1369   :  { %v1171_v37 = vadd.f32 %v1169_v36, %v1161_v33 }
0x136a   :  { %1767 = vtanh.f32 %v1126_v35 }
0x136b   :  { %1769 = vtanh.f32 %v1171_v37 }
0x1374   :  { %v1768_v38 = vpop.eup %1767 }
0x1375   :  { %v1770_v39 = vpop.eup %1769  ;;  %1129 = vrot.lane.b32.xlu1 %v1768_v38, %s1960_s27 }
0x1376   :  { %1174 = vrot.lane.b32.xlu0 %v1770_v39, %s1960_s27 }
0x13e7   :  { %v1130_v40 = vpop.permute.xlu1 %1129 }
0x13e8   :  { %v1132_v41 = vmul.f32 %v1764_v20, %v1130_v40  ;;  %v1175_v42 = vpop.permute.xlu0 %1174 }
0x13e9   :  { %v1177_v43 = vmul.f32 %v1766_v27, %v1175_v42 }
0x13ea   :  { %v1133_v45 = vpack.c.bf16 %v1132_v41, %v1132_v41 }
0x13eb   :  { %v2379_v13 = vpack.c.bf16 %v1177_v43, %v1177_v43 }
0x13ec   :  { %v1141_v46 = vrot.slane %v1133_v45, %v2105_v6 }
0x13ed   :  { %v1192_v47 = vrot.slane %v2379_v13, %v2105_v6 }
0x13ee   :  { %v1148_v48 = vrot.slane %v1141_v46, %v2105_v6 }
0x13ef   :  { %v1199_v49 = vrot.slane %v1192_v47, %v2105_v6 }
0x13f0   :  { %1149 = vrot.lane.b32.xlu1 %v1148_v48, %s1963_s1 }
0x13f1   :  { %1200 = vrot.lane.b32.xlu0 %v1199_v49, %s1973_s2 }
0x1462   :  { %v1150_v50 = vpop.permute.xlu1 %1149 }
0x1463   :  { %1152 = vst.msk [vmem:[#allocation4] sm:$0x1] %vm192_vm1, %v1150_v50  ;;  %v1201_v51 = vpop.permute.xlu0 %1200 }
0x1464   :  { %1203 = vst.msk [vmem:[#allocation4] sm:$0x1] %vm213_vm3, %v1201_v51  ;;  %v1038_v51 = vrot.slane %v2350_v61, 4 }
0x146b   :  { %v1204_v52 = vld [vmem:[#allocation4] sm:$0x1] }
0x146c   :  { %1601 = vmatmul.mubr.msk.bf16.vlgmr.msra.gmra.mrb[16].mxu0 %vm256_vm4, %v1204_v52 }
0x146d   :  { %1628 = vmatprep.mubr.msk.bf16.mxu0 %vm1971_vm0, %v1970_v3 }
0x153f   :  { %v1242_v53 = vpop.f32.mrb[16].mxu0 }
0x1540   :  { %v1250_v55 = vadd.f32 %v1249_v54, %v1242_v53  ;;  %v1244_v56 = vpop.f32.mrb[17].mxu0 }
0x1541   :  { %v1295_v57 = vadd.f32 %v2187_v60, %v1244_v56  ;;  %v1246_v58 = vpop.f32.mrb[18].mxu0 }
0x1542   :  { %1771 = vtanh.f32 %v1250_v55  ;;  %v1247_v59 = vpop.f32.mrb[19].mxu0  ;;  %v1602_v0 = vmul.f32 -1.442695, %v1250_v55  ;;  %v612_v58 = vrot.slane %v2242_v34, 7  ;;  %v1665_v34 = vld [vmem:[%s2499_s7] sm:$0xff]  }
0x1543   :  { %1773 = vtanh.f32 %v1295_v57  ;;  %v1603_v1 = vmul.f32 -1.442695, %v1295_v57  ;;  %1625 = vmatpush3.bf16.msra.mxu0 %v1665_v34 }
0x1544   :  { %1775 = vpow2.f32 %v1602_v0  ;;  %v1180_v0 = vrot.slane %v2379_v13, 3  ;;  %1626 = vmatprep.subr.bf16.mxu0 %v1970_v3 }
0x1545   :  { %1777 = vpow2.f32 %v1603_v1 }
0x154c   :  { %v1772_v62 = vpop.eup %1771 }
0x154d   :  { %v1774_v63 = vpop.eup %1773  ;;  %1260 = vrot.lane.b32.xlu1 %v1772_v62, %s1960_s27  ;;  %v896_v62 = vrot.slane %v2314_v7, 5  ;;  %v1666_v7 = vld [vmem:[%s2499_s7 + $0x8] sm:$0xff]   ;;  %s1974_s7 = smov [#allocation14]  }
0x154e   :  { %1305 = vrot.lane.b32.xlu0 %v1774_v63, %s1960_s27  ;;  %v1776_v2 = vpop.eup %1775  ;;  %1627 = vmatpush3.bf16.msra.mxu0 %v1666_v7  ;;  %s1533_s24 = sshll.u32 %s1974_s7, 4  ;;  %s1534_s24 = int_to_ptr.vmem [resolvable:$true] %s1533_s24 }
0x154f   :  { %v1778_v4 = vpop.eup %1777  ;;  %v1254_v5 = vadd.f32 1.0, %v1776_v2  ;;  %p1888_p5 = scmp.lt.s32.totalorder %s1534_s24, %s1534_s24 }
0x1550   :  { %v1299_v8 = vadd.f32 1.0, %v1778_v4 }
0x1551   :  { %1779 = vrcp.f32 %v1254_v5 }
0x1552   :  { %1781 = vrcp.f32 %v1299_v8 }
0x155b   :  { %v1780_v9 = vpop.eup %1779 }
0x155c   :  { %v1782_v12 = vpop.eup %1781  ;;  %v1258_v17 = vmul.f32 %v1780_v9, %v1126_v35 }
0x155d   :  { %v1303_v21 = vmul.f32 %v1782_v12, %v1171_v37 }
0x15bf   :  { %v1261_v10 = vpop.permute.xlu1 %1260 }
0x15c0   :  { %v1263_v14 = vmul.f32 %v1780_v9, %v1261_v10  ;;  %v1306_v15 = vpop.permute.xlu0 %1305 }
0x15c1   :  { %v1308_v11 = vmul.f32 %v1782_v12, %v1306_v15 }
0x15c2   :  { %1265 = vrot.lane.b32.xlu1 %v1263_v14, %s1960_s27 }
0x15c3   :  { %1310 = vrot.lane.b32.xlu0 %v1308_v11, %s1960_s27 }
0x1634   :  { %v1266_v18 = vpop.permute.xlu1 %1265 }
0x1635   :  { %v1268_v22 = vadd.f32 %v1266_v18, %v1258_v17  ;;  %v1311_v24 = vpop.permute.xlu0 %1310 }
0x1636   :  { %v1313_v25 = vadd.f32 %v1311_v24, %v1303_v21 }
0x1637   :  { %1783 = vtanh.f32 %v1268_v22 }
0x1638   :  { %1785 = vtanh.f32 %v1313_v25 }
0x1641   :  { %v1784_v16 = vpop.eup %1783 }
0x1642   :  { %v1786_v19 = vpop.eup %1785  ;;  %1271 = vrot.lane.b32.xlu1 %v1784_v16, %s1960_s27 }
0x1643   :  { %1316 = vrot.lane.b32.xlu0 %v1786_v19, %s1960_s27 }
0x16b4   :  { %v1272_v20 = vpop.permute.xlu1 %1271 }
0x16b5   :  { %v1274_v26 = vmul.f32 %v1780_v9, %v1272_v20  ;;  %v1317_v27 = vpop.permute.xlu0 %1316 }
0x16b6   :  { %v1319_v28 = vmul.f32 %v1782_v12, %v1317_v27 }
0x16b7   :  { %v1275_v29 = vpack.c.bf16 %v1274_v26, %v1274_v26 }
0x16b8   :  { %v1320_v30 = vpack.c.bf16 %v1319_v28, %v1319_v28 }
0x16b9   :  { %v1283_v31 = vrot.slane %v1275_v29, %v2105_v6 }
0x16ba   :  { %v1334_v32 = vrot.slane %v1320_v30, %v2105_v6  ;;  %v1322_v52 = vrot.slane %v1320_v30, 2 }
0x16bb   :  { %v1290_v33 = vrot.slane %v1283_v31, %v2105_v6 }
0x16bc   :  { %v1341_v35 = vrot.slane %v1334_v32, %v2105_v6 }
0x16bd   :  { %1291 = vrot.lane.b32.xlu1 %v1290_v33, %s1963_s1 }
0x16be   :  { %1342 = vrot.lane.b32.xlu0 %v1341_v35, %s1973_s2 }
0x172f   :  { %v1292_v36 = vpop.permute.xlu1 %1291 }
0x1730   :  { %1294 = vst.msk [vmem:[#allocation4] sm:$0x1] %vm192_vm1, %v1292_v36  ;;  %v1343_v37 = vpop.permute.xlu0 %1342 }
0x1731   :  { %1345 = vst.msk [vmem:[#allocation4] sm:$0x1] %vm213_vm3, %v1343_v37 }
0x1738   :  { %v1346_v38 = vld [vmem:[#allocation4] sm:$0x1] }
0x1739   :  { %1604 = vmatmul.mubr.msk.bf16.vlgmr.msra.gmra.mrb[16].mxu1 %vm256_vm4, %v1346_v38 }
0x180c   :  { %v1384_v39 = vpop.f32.mrb[16].mxu1 }
0x180d   :  { %v1385_v40 = vpop.f32.mrb[17].mxu1 }
0x180e   :  { %v1390_v41 = vadd.f32 %v2187_v60, %v1385_v40  ;;  %v1387_v42 = vpop.f32.mrb[18].mxu1  ;;  %v754_v60 = vrot.slane %v2278_v23, 6 }
0x180f   :  { %v1388_v43 = vpop.f32.mrb[19].mxu1 }
0x1810   :  { %1787 = vtanh.f32 %v1390_v41  ;;  %v1605_v45 = vmul.f32 -1.442695, %v1390_v41 }
0x1812   :  { %1789 = vpow2.f32 %v1605_v45 }
0x181a   :  { %v1788_v6 = vpop.eup %1787 }
0x181b   :  { %1400 = vrot.lane.b32.xlu1 %v1788_v6, %s1960_s27 }
0x181c   :  { %v1790_v46 = vpop.eup %1789 }
0x181d   :  { %v1394_v47 = vadd.f32 1.0, %v1790_v46 }
0x181f   :  { %1791 = vrcp.f32 %v1394_v47 }
0x1829   :  { %v1792_v48 = vpop.eup %1791 }
0x182a   :  { %v1398_v53 = vmul.f32 %v1792_v48, %v1313_v25 }
0x188d   :  { %v1401_v49 = vpop.permute.xlu1 %1400 }
0x188e   :  { %v1403_v50 = vmul.f32 %v1792_v48, %v1401_v49 }
0x1890   :  { %1405 = vrot.lane.b32.xlu0 %v1403_v50, %s1960_s27 }
0x1894   :  { %472 = vrot.lane.b32.xlu0 %v2206_v44, %s1963_s1 }
0x1898   :  { %755 = vrot.lane.b32.xlu0 %v754_v60, %s1963_s1 }
0x189c   :  { %1039 = vrot.lane.b32.xlu0 %v1038_v51, %s1963_s1 }
0x18a0   :  { %1323 = vrot.lane.b32.xlu0 %v1322_v52, %s1963_s1 }
0x18a4   :  { %1424 = vrot.lane.b32.xlu0 %v1274_v26, %s1963_s1 }
0x18a8   :  { %1436 = vrot.lane.b32.xlu0 %v1268_v22, %s1973_s2 }
0x1902   :  { %v1406_v54 = vpop.permute.xlu0 %1405 }
0x1903   :  { %v1408_v55 = vadd.f32 %v1406_v54, %v1398_v53 }
0x1905   :  { %1793 = vtanh.f32 %v1408_v55 }
0x1906   :  { %v473_v44 = vpop.permute.xlu0 %472 }
0x1907   :  { %475 = vst.msk [vmem:[#allocation3] sm:$0x1] %vm192_vm1, %v473_v44 }
0x190a   :  { %v756_v23 = vpop.permute.xlu0 %755 }
0x190b   :  { %759 = vst.msk [vmem:[#allocation3] sm:$0x4] %vm758_vm5, %v756_v23 }
0x190e   :  { %v1040_v61 = vpop.permute.xlu0 %1039 }
0x190f   :  { %v1794_v56 = vpop.eup %1793  ;;  %1043 = vst.msk [vmem:[#allocation3] sm:$0x10] %vm1042_vm6, %v1040_v61 }
0x1910   :  { %1411 = vrot.lane.b32.xlu1 %v1794_v56, %s1960_s27 }
0x1912   :  { %v1324_v57 = vpop.permute.xlu0 %1323 }
0x1913   :  { %1327 = vst.msk [vmem:[#allocation3] sm:$0x40] %vm1326_vm7, %v1324_v57 }
0x1914   :  { %613 = vrot.lane.b32.xlu1 %v612_v58, %s1963_s1 }
0x1916   :  { %v1425_v59 = vpop.permute.xlu0 %1424 }
0x1917   :  { %1428 = vst.msk [vmem:[#allocation14] sm:$0x3] %vm1427_vm8, %v1425_v59 }
0x1918   :  { %897 = vrot.lane.b32.xlu1 %v896_v62, %s1963_s1 }
0x191a   :  { %v1437_v63 = vpop.permute.xlu0 %1436 }
0x191b   :  { %1439 = vst.msk [vmem:[#allocation16] sm:$0x3] %vm1427_vm8, %v1437_v63 }
0x191c   :  { %1181 = vrot.lane.b32.xlu1 %v1180_v0, %s1963_s1 }
0x1982   :  { %v1412_v1 = vpop.permute.xlu1 %1411 }
0x1983   :  { %v1414_v2 = vmul.f32 %v1792_v48, %v1412_v1 }
0x1985   :  { %v1415_v13 = vpack.c.bf16 %v1414_v2, %v1414_v2 }
0x1986   :  { %v614_v4 = vpop.permute.xlu1 %613 }
0x1987   :  { %617 = vst.msk [vmem:[#allocation3] sm:$0x2] %vm616_vm9, %v614_v4  ;;  %v1417_v5 = vrot.slane %v1415_v13, 1 }
0x1989   :  { %1418 = vrot.lane.b32.xlu1 %v1417_v5, %s1963_s1 }
0x198a   :  { %v898_v8 = vpop.permute.xlu1 %897 }
0x198b   :  { %901 = vst.msk [vmem:[#allocation3] sm:$0x8] %vm900_vm10, %v898_v8 }
0x198d   :  { %1430 = vrot.lane.b32.xlu1 %v1414_v2, %s1963_s1  ;;  %s1883_s1 = scalar_lea.vmem %s1534_s24, 64 }
0x198e   :  { %v1182_v3 = vpop.permute.xlu1 %1181  ;;  %p1884_p4 = scmp.ne.s32.totalorder %s1534_s24, %s1883_s1  ;;  %p1889_p6 = scmp.lt.s32.totalorder %s1883_s1, %s1883_s1 }
0x198f   :  { %1185 = vst.msk [vmem:[#allocation3] sm:$0x20] %vm1184_vm11, %v1182_v3 }
0x1990   :  { %p1890_p7 = por %p1889_p6, %p1888_p5 }
0x1991   :  { %1441 = vrot.lane.b32.xlu1 %v1408_v55, %s1973_s2 }
0x1992   :  { %p1891_p8 = pnand %p1890_p7, %p1884_p4 }
0x19fb   :  { %v1419_v9 = vpop.permute.xlu1 %1418 }
0x19fc   :  { %1422 = vst.msk [vmem:[#allocation3] sm:$0x80] %vm1421_vm12, %v1419_v9 }
0x19ff   :  { %v1431_v10 = vpop.permute.xlu1 %1430 }
0x1a00   :  { %1434 = vst.msk [vmem:[#allocation14 + $0x2] sm:$0x3] %vm1427_vm8, %v1431_v10 }
0x1a03   :  { %v1442_v12 = vpop.permute.xlu1 %1441  ;;  %v1446_v14 = vld [vmem:[#allocation3] sm:$0xff] }
0x1a04   :  { %1445 = vst.msk [vmem:[#allocation16 + $0x2] sm:$0x3] %vm1427_vm8, %v1442_v12  ;;  %1629 = vmatmul.mubr.msk.bf16.vlgmr.msra.gmra.mrb[20].mxu0 %vm123_vm2, %v1446_v14 }
0x1a05   :  { %1894 = shalt.err (!%p1891_p8)
}
0x1a06   :  { %s1895_s12 = scalar_lea.hbm %s2502_s10, 64 }
0x1a07   :  { %p1896_p9 = scmp.ne.s32.totalorder %s2502_s10, %s1895_s12  ;;  %p1899_p10 = scmp.lt.u32.totalorder %s1895_s12, %s2502_s10 }
0x1a09   :  { %p1901_p11 = pnand %p1899_p10, %p1896_p9 }
0x1a0b   :  { %1904 = shalt.err (!%p1901_p11)
}
0x1a0c   :  { %1539 = dma.vmem_to_hbm [thread:$0]  %s1534_s24, 64, %s2502_s10, [#allocation15], %s1960_s27, %s1960_s27, %s1961_s28  }
0x1a0d   :  { %s1975_s17 = smov [#allocation16]  }
0x1a0e   :  { %s1545_s19 = sshll.u32 %s1975_s17, 4  ;;  %s1546_s19 = int_to_ptr.vmem [resolvable:$true] %s1545_s19 }
0x1a0f   :  { %s1905_s4 = scalar_lea.vmem %s1546_s19, 64  ;;  %p1910_p13 = scmp.lt.s32.totalorder %s1546_s19, %s1546_s19 }
0x1a10   :  { %p1906_p12 = scmp.ne.s32.totalorder %s1546_s19, %s1905_s4  ;;  %p1911_p0 = scmp.lt.s32.totalorder %s1905_s4, %s1905_s4 }
0x1a12   :  { %p1912_p1 = por %p1911_p0, %p1910_p13 }
0x1a14   :  { %p1913_p2 = pnand %p1912_p1, %p1906_p12 }
0x1a16   :  { %1916 = shalt.err (!%p1913_p2)
}
0x1a17   :  { %s1917_s13 = scalar_lea.hbm %s2503_s11, 64 }
0x1a18   :  { %p1918_p3 = scmp.ne.s32.totalorder %s2503_s11, %s1917_s13  ;;  %p1921_p4 = scmp.lt.u32.totalorder %s1917_s13, %s2503_s11 }
0x1a1a   :  { %p1923_p5 = pnand %p1921_p4, %p1918_p3 }
0x1a1c   :  { %1926 = shalt.err (!%p1923_p5)
}
0x1a1d   :  { %1551 = dma.vmem_to_hbm [thread:$0]  %s1546_s19, 64, %s2503_s11, [#allocation15], %s1960_s27, %s1960_s27, %s1961_s28  }
0x1a1e   :  { %v1606_v15 = vld [vmem:[%s2500_s8] ss:$0 sm:$0xff]  ;;  %s1976_s1 = smov [#allocation13]  }
0x1a1f   :  { %s1521_s25 = sshll.u32 %s1976_s1, 4  ;;  %s1522_s25 = int_to_ptr.vmem [resolvable:$true] %s1521_s25 }
0x1a20   :  { %s1927_s29 = scalar_lea.vmem %s1522_s25, 256  ;;  %p1932_p7 = scmp.lt.s32.totalorder %s1522_s25, %s1522_s25 }
0x1a21   :  { %p1928_p6 = scmp.ne.s32.totalorder %s1522_s25, %s1927_s29  ;;  %p1933_p8 = scmp.lt.s32.totalorder %s1927_s29, %s1927_s29 }
0x1a23   :  { %p1934_p9 = por %p1933_p8, %p1932_p7 }
0x1a25   :  { %p1935_p10 = pnand %p1934_p9, %p1928_p6 }
0x1ad7   :  { %v1507_v11 = vpop.f32.mrb[20].mxu0 }
0x1ad8   :  { %v1508_v17 = vadd.f32 %v1606_v15, %v1507_v11  ;;  %v1630_v18 = vpop.f32.mrb[21].mxu0 }
0x1ad9   :  { %v1510_v21 = vpop.f32.mrb[22].mxu0 }
0x1ada   :  { %1514 = vst [vmem:[#allocation13] sm:$0xff] %v1508_v17  ;;  %v1511_v22 = vadd.f32 %v1606_v15, %v1510_v21  ;;  %v1631_v24 = vpop.f32.mrb[23].mxu0 }
0x1adc   :  { %1515 = vst [vmem:[#allocation13 + $0x8] sm:$0xff] %v1511_v22 }
0x1add   :  { %1938 = shalt.err (!%p1935_p10)
}
0x1ade   :  { %s1939_s27 = scalar_lea.hbm %s2501_s9, 256 }
0x1adf   :  { %p1940_p11 = scmp.ne.s32.totalorder %s2501_s9, %s1939_s27  ;;  %p1943_p12 = scmp.lt.u32.totalorder %s1939_s27, %s2501_s9 }
0x1ae1   :  { %p1945_p13 = pnand %p1943_p12, %p1940_p11 }
0x1ae3   :  { %1948 = shalt.err (!%p1945_p13)
}
0x1ae4   :  { %1527 = dma.vmem_to_hbm [thread:$0]  %s1522_s25, 256, %s2501_s9, [#allocation7], %s1967_s3, %s1967_s3, %s1968_s18  }
0x1ae5   :  { %1955 = dma.done.wait [#allocation7], 256  }
0x1ae6   :  { %1956 = vsyncadd [#allocation7], 4294967040 }
0x1ae7   :  { %1957 = dma.done.wait [#allocation15], 128  }
0x1ae8   :  { %1958 = vsyncadd [#allocation15], 4294967168 }
0x1ae9   :  { %1561 = vsyncpa [#allocation6], 1 }
0x1aea   :  { %1562 = vsyncpa [#allocation9], 1 }
0x1aeb   :  { %1563 = vsyncpa [#allocation12], 1 }
0x1aec   :  { %1564 = vsyncpa [#allocation7], 1 }
0x1aed   :  { %1565 = vsyncpa [#allocation15], 1 }

</bundles_post_ra>
